<compile_context>
chip_gen: v7x
topology: tpu7x:2x2x1
jax: 0.10.0
libtpu: 0.0.40
codegen_flags: <defaults>
</compile_context>

<pallas_src>
import jax
import jax.numpy as jnp
from jax.experimental import pallas as pl
from jax.experimental.pallas import tpu as pltpu


def _lstm_kernel(x_ref, wx_ref, wh_ref, b_ref, wfc_ref, bfc_ref, y_ref):
    """Whole-sequence LSTM + final Linear in one kernel invocation.

    x_ref   : (B, T, I)  batch-first input (as in PyTorch)
    wx_ref  : (I, 4H)    input->gate weights, lane-stacked gates i|f|g|o
    wh_ref  : (H, 4H)    hidden->gate weights, lane-stacked gates i|f|g|o
    b_ref   : (1, 4H)    bias_ih + bias_hh
    wfc_ref : (H, O)     final linear weight (transposed)
    bfc_ref : (1, O)     final linear bias
    y_ref   : (B, O)     output = fc(h_T)
    """
    B, T, I = x_ref.shape
    H = wh_ref.shape[0]

    # Load everything once (all tiny).
    x = x_ref[...]          # (B, T, I)
    wx = wx_ref[...]        # (I, 4H)
    wh = wh_ref[...]        # (H, 4H)
    b = b_ref[...]          # (1, 4H)

    # --- Hoist the input projection + bias out of the recurrent chain. -------
    # For I == 1, x_t @ Wx is just a broadcast multiply (no MXU needed).
    xproj = []
    for t in range(T):
        x_t = x[:, t, :]                                     # (B, I), static slice
        if I == 1:
            xproj.append(x_t * wx + b)                       # (B,1)*(1,4H) -> (B,4H)
        else:
            xproj.append(
                jnp.dot(x_t, wx, preferred_element_type=jnp.float32) + b)

    # --- Recurrent chain: one fused matmul + EUP activations per step. -------
    # T is small & static, so a fully-unrolled Python loop keeps all indices
    # static and h/c live in vregs (no VMEM scratch round-trips per step).
    h = jnp.zeros((B, H), jnp.float32)
    c = jnp.zeros((B, H), jnp.float32)

    for t in range(T):
        gates = xproj[t] + jnp.dot(h, wh, preferred_element_type=jnp.float32)  # (B,4H)
        sig = jax.nn.sigmoid(gates)          # sigmoid over the whole tile (i|f|.|o used)
        i_g = sig[:, 0 * H:1 * H]
        f_g = sig[:, 1 * H:2 * H]
        o_g = sig[:, 3 * H:4 * H]
        g_g = jnp.tanh(gates[:, 2 * H:3 * H])
        c = f_g * c + i_g * g_g
        h = o_g * jnp.tanh(c)

    # --- Fused final FC projection on the last hidden state. -----------------
    y_ref[...] = (jnp.dot(h, wfc_ref[...], preferred_element_type=jnp.float32)
                  + bfc_ref[...])


def prepare_params(w_ih, w_hh, b_ih, b_hh, w_fc, b_fc):
    """One-time conversion of PyTorch-layout params into the kernel layout."""
    H = w_hh.shape[1]
    wx = jnp.asarray(w_ih, jnp.float32).T                        # (I, 4H)
    wh = jnp.asarray(w_hh, jnp.float32).T                        # (H, 4H)
    b = (jnp.asarray(b_ih, jnp.float32)
         + jnp.asarray(b_hh, jnp.float32)).reshape(1, 4 * H)     # (1, 4H)
    wfc_t = jnp.asarray(w_fc, jnp.float32).T                     # (H, O)
    bfc = jnp.asarray(b_fc, jnp.float32).reshape(1, -1)          # (1, O)
    return wx, wh, b, wfc_t, bfc


@jax.jit
def lstm_predictor_forward(x, wx, wh, b, wfc_t, bfc):
    """x: (B, T, I) float32 batch-first.  Returns (B, O) float32."""
    B, T, I = x.shape
    O = wfc_t.shape[1]
    vmem = pl.BlockSpec(memory_space=pltpu.MemorySpace.VMEM)     # whole array in VMEM
    return pl.pallas_call(
        _lstm_kernel,
        out_shape=jax.ShapeDtypeStruct((B, O), jnp.float32),
        in_specs=[vmem] * 6,
        out_specs=vmem,
    )(x, wx, wh, b, wfc_t, bfc)


def _reference_forward(x, w_ih, w_hh, b_ih, b_hh, w_fc, b_fc):
    """Pure-JAX reference reproducing nn.LSTM + nn.Linear forward."""
    B, T, I = x.shape
    H = w_hh.shape[1]

    def step(carry, x_t):
        h, c = carry
        gates = x_t @ w_ih.T + b_ih + h @ w_hh.T + b_hh
        i, f, g, o = jnp.split(gates, 4, axis=-1)
        i = jax.nn.sigmoid(i)
        f = jax.nn.sigmoid(f)
        g = jnp.tanh(g)
        o = jax.nn.sigmoid(o)
        c = f * c + i * g
        h = o * jnp.tanh(c)
        return (h, c), h

    init = (jnp.zeros((B, H), jnp.float32), jnp.zeros((B, H), jnp.float32))
    (h_last, _), _ = jax.lax.scan(step, init, jnp.transpose(x, (1, 0, 2)))
    return h_last @ w_fc.T + b_fc


if __name__ == "__main__":
    # Module-implied sizes (defaults of LSTMPredictor.__init__).
    INPUT_SIZE, HIDDEN_SIZE, OUTPUT_SIZE = 1, 20, 1
    B, T = 4, 8

    key = jax.random.PRNGKey(0)
    keys = jax.random.split(key, 8)
    bound = 1.0 / jnp.sqrt(jnp.float32(HIDDEN_SIZE))   # PyTorch-style uniform init

    def u(k, shape):
        return jax.random.uniform(k, shape, jnp.float32, -bound, bound)

    x = jax.random.normal(keys[0], (B, T, INPUT_SIZE), jnp.float32)
    w_ih = u(keys[1], (4 * HIDDEN_SIZE, INPUT_SIZE))
    w_hh = u(keys[2], (4 * HIDDEN_SIZE, HIDDEN_SIZE))
    b_ih = u(keys[3], (4 * HIDDEN_SIZE,))
    b_hh = u(keys[4], (4 * HIDDEN_SIZE,))
    w_fc = u(keys[5], (OUTPUT_SIZE, HIDDEN_SIZE))
    b_fc = u(keys[6], (OUTPUT_SIZE,))

    # One-time parameter layout prep (kept out of the per-call path).
    params = prepare_params(w_ih, w_hh, b_ih, b_hh, w_fc, b_fc)
    params = jax.tree_util.tree_map(jax.block_until_ready, params)

    y = lstm_predictor_forward(x, *params)
    y = jax.block_until_ready(y)

    y_ref = _reference_forward(x, w_ih, w_hh, b_ih, b_hh, w_fc, b_fc)
    assert y.shape == (B, OUTPUT_SIZE)
    assert jnp.allclose(y, y_ref, atol=1e-5, rtol=1e-5), (y, y_ref)

    print("KERNEL_OK")
</pallas_src>

<mosaic_0001>
module attributes {stable_mosaic.version = 11 : i64} {
  func.func @_lstm_kernel(%arg0: memref<4x8x1xf32, #tpu.memory_space<vmem>>, %arg1: memref<1x80xf32, #tpu.memory_space<vmem>>, %arg2: memref<20x80xf32, #tpu.memory_space<vmem>>, %arg3: memref<1x80xf32, #tpu.memory_space<vmem>>, %arg4: memref<20x1xf32, #tpu.memory_space<vmem>>, %arg5: memref<1x1xf32, #tpu.memory_space<vmem>>, %arg6: memref<4x1xf32, #tpu.memory_space<vmem>>) attributes {dimension_semantics = [], scalar_prefetch = 0 : i64, scratch_operands = 0 : i64, tpu.core_type = #tpu.core_type<tc>} {
    %c0 = arith.constant 0 : index
    %c0_0 = arith.constant 0 : index
    %c0_1 = arith.constant 0 : index
    %0 = vector.load %arg0[%c0, %c0_0, %c0_1] : memref<4x8x1xf32, #tpu.memory_space<vmem>>, vector<4x8x1xf32>
    %c0_2 = arith.constant 0 : index
    %c0_3 = arith.constant 0 : index
    %1 = vector.load %arg1[%c0_2, %c0_3] : memref<1x80xf32, #tpu.memory_space<vmem>>, vector<1x80xf32>
    %c0_4 = arith.constant 0 : index
    %c0_5 = arith.constant 0 : index
    %2 = vector.load %arg2[%c0_4, %c0_5] : memref<20x80xf32, #tpu.memory_space<vmem>>, vector<20x80xf32>
    %c0_6 = arith.constant 0 : index
    %c0_7 = arith.constant 0 : index
    %3 = vector.load %arg3[%c0_6, %c0_7] : memref<1x80xf32, #tpu.memory_space<vmem>>, vector<1x80xf32>
    %4 = vector.extract_strided_slice %0 {offsets = [0, 0, 0], sizes = [4, 1, 1], strides = [1, 1, 1]} : vector<4x8x1xf32> to vector<4x1x1xf32>
    %5 = vector.shape_cast %4 : vector<4x1x1xf32> to vector<4x1xf32>
    %6 = vector.broadcast %5 : vector<4x1xf32> to vector<4x80xf32>
    %7 = vector.broadcast %1 : vector<1x80xf32> to vector<4x80xf32>
    %8 = arith.mulf %6, %7 : vector<4x80xf32>
    %9 = vector.broadcast %3 : vector<1x80xf32> to vector<4x80xf32>
    %10 = arith.addf %8, %9 : vector<4x80xf32>
    %11 = vector.extract_strided_slice %0 {offsets = [0, 1, 0], sizes = [4, 1, 1], strides = [1, 1, 1]} : vector<4x8x1xf32> to vector<4x1x1xf32>
    %12 = vector.shape_cast %11 : vector<4x1x1xf32> to vector<4x1xf32>
    %13 = vector.broadcast %12 : vector<4x1xf32> to vector<4x80xf32>
    %14 = vector.broadcast %1 : vector<1x80xf32> to vector<4x80xf32>
    %15 = arith.mulf %13, %14 : vector<4x80xf32>
    %16 = vector.broadcast %3 : vector<1x80xf32> to vector<4x80xf32>
    %17 = arith.addf %15, %16 : vector<4x80xf32>
    %18 = vector.extract_strided_slice %0 {offsets = [0, 2, 0], sizes = [4, 1, 1], strides = [1, 1, 1]} : vector<4x8x1xf32> to vector<4x1x1xf32>
    %19 = vector.shape_cast %18 : vector<4x1x1xf32> to vector<4x1xf32>
    %20 = vector.broadcast %19 : vector<4x1xf32> to vector<4x80xf32>
    %21 = vector.broadcast %1 : vector<1x80xf32> to vector<4x80xf32>
    %22 = arith.mulf %20, %21 : vector<4x80xf32>
    %23 = vector.broadcast %3 : vector<1x80xf32> to vector<4x80xf32>
    %24 = arith.addf %22, %23 : vector<4x80xf32>
    %25 = vector.extract_strided_slice %0 {offsets = [0, 3, 0], sizes = [4, 1, 1], strides = [1, 1, 1]} : vector<4x8x1xf32> to vector<4x1x1xf32>
    %26 = vector.shape_cast %25 : vector<4x1x1xf32> to vector<4x1xf32>
    %27 = vector.broadcast %26 : vector<4x1xf32> to vector<4x80xf32>
    %28 = vector.broadcast %1 : vector<1x80xf32> to vector<4x80xf32>
    %29 = arith.mulf %27, %28 : vector<4x80xf32>
    %30 = vector.broadcast %3 : vector<1x80xf32> to vector<4x80xf32>
    %31 = arith.addf %29, %30 : vector<4x80xf32>
    %32 = vector.extract_strided_slice %0 {offsets = [0, 4, 0], sizes = [4, 1, 1], strides = [1, 1, 1]} : vector<4x8x1xf32> to vector<4x1x1xf32>
    %33 = vector.shape_cast %32 : vector<4x1x1xf32> to vector<4x1xf32>
    %34 = vector.broadcast %33 : vector<4x1xf32> to vector<4x80xf32>
    %35 = vector.broadcast %1 : vector<1x80xf32> to vector<4x80xf32>
    %36 = arith.mulf %34, %35 : vector<4x80xf32>
    %37 = vector.broadcast %3 : vector<1x80xf32> to vector<4x80xf32>
    %38 = arith.addf %36, %37 : vector<4x80xf32>
    %39 = vector.extract_strided_slice %0 {offsets = [0, 5, 0], sizes = [4, 1, 1], strides = [1, 1, 1]} : vector<4x8x1xf32> to vector<4x1x1xf32>
    %40 = vector.shape_cast %39 : vector<4x1x1xf32> to vector<4x1xf32>
    %41 = vector.broadcast %40 : vector<4x1xf32> to vector<4x80xf32>
    %42 = vector.broadcast %1 : vector<1x80xf32> to vector<4x80xf32>
    %43 = arith.mulf %41, %42 : vector<4x80xf32>
    %44 = vector.broadcast %3 : vector<1x80xf32> to vector<4x80xf32>
    %45 = arith.addf %43, %44 : vector<4x80xf32>
    %46 = vector.extract_strided_slice %0 {offsets = [0, 6, 0], sizes = [4, 1, 1], strides = [1, 1, 1]} : vector<4x8x1xf32> to vector<4x1x1xf32>
    %47 = vector.shape_cast %46 : vector<4x1x1xf32> to vector<4x1xf32>
    %48 = vector.broadcast %47 : vector<4x1xf32> to vector<4x80xf32>
    %49 = vector.broadcast %1 : vector<1x80xf32> to vector<4x80xf32>
    %50 = arith.mulf %48, %49 : vector<4x80xf32>
    %51 = vector.broadcast %3 : vector<1x80xf32> to vector<4x80xf32>
    %52 = arith.addf %50, %51 : vector<4x80xf32>
    %53 = vector.extract_strided_slice %0 {offsets = [0, 7, 0], sizes = [4, 1, 1], strides = [1, 1, 1]} : vector<4x8x1xf32> to vector<4x1x1xf32>
    %54 = vector.shape_cast %53 : vector<4x1x1xf32> to vector<4x1xf32>
    %55 = vector.broadcast %54 : vector<4x1xf32> to vector<4x80xf32>
    %56 = vector.broadcast %1 : vector<1x80xf32> to vector<4x80xf32>
    %57 = arith.mulf %55, %56 : vector<4x80xf32>
    %58 = vector.broadcast %3 : vector<1x80xf32> to vector<4x80xf32>
    %59 = arith.addf %57, %58 : vector<4x80xf32>
    %cst = arith.constant 0.000000e+00 : f32
    %60 = vector.broadcast %cst : f32 to vector<4x20xf32>
    %cst_8 = arith.constant 0.000000e+00 : f32
    %61 = vector.broadcast %cst_8 : f32 to vector<4x20xf32>
    %cst_9 = arith.constant dense<0.000000e+00> : vector<4x80xf32>
    %62 = tpu.matmul %60, %2, %cst_9 {dimension_numbers = #tpu.dot_dimension_numbers<[1], [0], [0], [1], [0, 0, 1, 1], [], []>} : vector<4x20xf32>, vector<20x80xf32>, vector<4x80xf32> -> vector<4x80xf32>
    %63 = arith.addf %10, %62 : vector<4x80xf32>
    %64 = arith.negf %63 : vector<4x80xf32>
    %65 = math.exp %64 : vector<4x80xf32>
    %cst_10 = arith.constant 1.000000e+00 : f32
    %66 = vector.broadcast %cst_10 : f32 to vector<4x80xf32>
    %67 = arith.addf %66, %65 : vector<4x80xf32>
    %68 = arith.divf %66, %67 : vector<4x80xf32>
    %69 = vector.extract_strided_slice %68 {offsets = [0, 0], sizes = [4, 20], strides = [1, 1]} : vector<4x80xf32> to vector<4x20xf32>
    %70 = vector.extract_strided_slice %68 {offsets = [0, 20], sizes = [4, 20], strides = [1, 1]} : vector<4x80xf32> to vector<4x20xf32>
    %71 = vector.extract_strided_slice %68 {offsets = [0, 60], sizes = [4, 20], strides = [1, 1]} : vector<4x80xf32> to vector<4x20xf32>
    %72 = vector.extract_strided_slice %63 {offsets = [0, 40], sizes = [4, 20], strides = [1, 1]} : vector<4x80xf32> to vector<4x20xf32>
    %73 = math.tanh %72 : vector<4x20xf32>
    %74 = arith.mulf %70, %61 : vector<4x20xf32>
    %75 = arith.mulf %69, %73 : vector<4x20xf32>
    %76 = arith.addf %74, %75 : vector<4x20xf32>
    %77 = math.tanh %76 : vector<4x20xf32>
    %78 = arith.mulf %71, %77 : vector<4x20xf32>
    %cst_11 = arith.constant dense<0.000000e+00> : vector<4x80xf32>
    %79 = tpu.matmul %78, %2, %cst_11 {dimension_numbers = #tpu.dot_dimension_numbers<[1], [0], [0], [1], [0, 0, 1, 1], [], []>} : vector<4x20xf32>, vector<20x80xf32>, vector<4x80xf32> -> vector<4x80xf32>
    %80 = arith.addf %17, %79 : vector<4x80xf32>
    %81 = arith.negf %80 : vector<4x80xf32>
    %82 = math.exp %81 : vector<4x80xf32>
    %cst_12 = arith.constant 1.000000e+00 : f32
    %83 = vector.broadcast %cst_12 : f32 to vector<4x80xf32>
    %84 = arith.addf %83, %82 : vector<4x80xf32>
    %85 = arith.divf %83, %84 : vector<4x80xf32>
    %86 = vector.extract_strided_slice %85 {offsets = [0, 0], sizes = [4, 20], strides = [1, 1]} : vector<4x80xf32> to vector<4x20xf32>
    %87 = vector.extract_strided_slice %85 {offsets = [0, 20], sizes = [4, 20], strides = [1, 1]} : vector<4x80xf32> to vector<4x20xf32>
    %88 = vector.extract_strided_slice %85 {offsets = [0, 60], sizes = [4, 20], strides = [1, 1]} : vector<4x80xf32> to vector<4x20xf32>
    %89 = vector.extract_strided_slice %80 {offsets = [0, 40], sizes = [4, 20], strides = [1, 1]} : vector<4x80xf32> to vector<4x20xf32>
    %90 = math.tanh %89 : vector<4x20xf32>
    %91 = arith.mulf %87, %76 : vector<4x20xf32>
    %92 = arith.mulf %86, %90 : vector<4x20xf32>
    %93 = arith.addf %91, %92 : vector<4x20xf32>
    %94 = math.tanh %93 : vector<4x20xf32>
    %95 = arith.mulf %88, %94 : vector<4x20xf32>
    %cst_13 = arith.constant dense<0.000000e+00> : vector<4x80xf32>
    %96 = tpu.matmul %95, %2, %cst_13 {dimension_numbers = #tpu.dot_dimension_numbers<[1], [0], [0], [1], [0, 0, 1, 1], [], []>} : vector<4x20xf32>, vector<20x80xf32>, vector<4x80xf32> -> vector<4x80xf32>
    %97 = arith.addf %24, %96 : vector<4x80xf32>
    %98 = arith.negf %97 : vector<4x80xf32>
    %99 = math.exp %98 : vector<4x80xf32>
    %cst_14 = arith.constant 1.000000e+00 : f32
    %100 = vector.broadcast %cst_14 : f32 to vector<4x80xf32>
    %101 = arith.addf %100, %99 : vector<4x80xf32>
    %102 = arith.divf %100, %101 : vector<4x80xf32>
    %103 = vector.extract_strided_slice %102 {offsets = [0, 0], sizes = [4, 20], strides = [1, 1]} : vector<4x80xf32> to vector<4x20xf32>
    %104 = vector.extract_strided_slice %102 {offsets = [0, 20], sizes = [4, 20], strides = [1, 1]} : vector<4x80xf32> to vector<4x20xf32>
    %105 = vector.extract_strided_slice %102 {offsets = [0, 60], sizes = [4, 20], strides = [1, 1]} : vector<4x80xf32> to vector<4x20xf32>
    %106 = vector.extract_strided_slice %97 {offsets = [0, 40], sizes = [4, 20], strides = [1, 1]} : vector<4x80xf32> to vector<4x20xf32>
    %107 = math.tanh %106 : vector<4x20xf32>
    %108 = arith.mulf %104, %93 : vector<4x20xf32>
    %109 = arith.mulf %103, %107 : vector<4x20xf32>
    %110 = arith.addf %108, %109 : vector<4x20xf32>
    %111 = math.tanh %110 : vector<4x20xf32>
    %112 = arith.mulf %105, %111 : vector<4x20xf32>
    %cst_15 = arith.constant dense<0.000000e+00> : vector<4x80xf32>
    %113 = tpu.matmul %112, %2, %cst_15 {dimension_numbers = #tpu.dot_dimension_numbers<[1], [0], [0], [1], [0, 0, 1, 1], [], []>} : vector<4x20xf32>, vector<20x80xf32>, vector<4x80xf32> -> vector<4x80xf32>
    %114 = arith.addf %31, %113 : vector<4x80xf32>
    %115 = arith.negf %114 : vector<4x80xf32>
    %116 = math.exp %115 : vector<4x80xf32>
    %cst_16 = arith.constant 1.000000e+00 : f32
    %117 = vector.broadcast %cst_16 : f32 to vector<4x80xf32>
    %118 = arith.addf %117, %116 : vector<4x80xf32>
    %119 = arith.divf %117, %118 : vector<4x80xf32>
    %120 = vector.extract_strided_slice %119 {offsets = [0, 0], sizes = [4, 20], strides = [1, 1]} : vector<4x80xf32> to vector<4x20xf32>
    %121 = vector.extract_strided_slice %119 {offsets = [0, 20], sizes = [4, 20], strides = [1, 1]} : vector<4x80xf32> to vector<4x20xf32>
    %122 = vector.extract_strided_slice %119 {offsets = [0, 60], sizes = [4, 20], strides = [1, 1]} : vector<4x80xf32> to vector<4x20xf32>
    %123 = vector.extract_strided_slice %114 {offsets = [0, 40], sizes = [4, 20], strides = [1, 1]} : vector<4x80xf32> to vector<4x20xf32>
    %124 = math.tanh %123 : vector<4x20xf32>
    %125 = arith.mulf %121, %110 : vector<4x20xf32>
    %126 = arith.mulf %120, %124 : vector<4x20xf32>
    %127 = arith.addf %125, %126 : vector<4x20xf32>
    %128 = math.tanh %127 : vector<4x20xf32>
    %129 = arith.mulf %122, %128 : vector<4x20xf32>
    %cst_17 = arith.constant dense<0.000000e+00> : vector<4x80xf32>
    %130 = tpu.matmul %129, %2, %cst_17 {dimension_numbers = #tpu.dot_dimension_numbers<[1], [0], [0], [1], [0, 0, 1, 1], [], []>} : vector<4x20xf32>, vector<20x80xf32>, vector<4x80xf32> -> vector<4x80xf32>
    %131 = arith.addf %38, %130 : vector<4x80xf32>
    %132 = arith.negf %131 : vector<4x80xf32>
    %133 = math.exp %132 : vector<4x80xf32>
    %cst_18 = arith.constant 1.000000e+00 : f32
    %134 = vector.broadcast %cst_18 : f32 to vector<4x80xf32>
    %135 = arith.addf %134, %133 : vector<4x80xf32>
    %136 = arith.divf %134, %135 : vector<4x80xf32>
    %137 = vector.extract_strided_slice %136 {offsets = [0, 0], sizes = [4, 20], strides = [1, 1]} : vector<4x80xf32> to vector<4x20xf32>
    %138 = vector.extract_strided_slice %136 {offsets = [0, 20], sizes = [4, 20], strides = [1, 1]} : vector<4x80xf32> to vector<4x20xf32>
    %139 = vector.extract_strided_slice %136 {offsets = [0, 60], sizes = [4, 20], strides = [1, 1]} : vector<4x80xf32> to vector<4x20xf32>
    %140 = vector.extract_strided_slice %131 {offsets = [0, 40], sizes = [4, 20], strides = [1, 1]} : vector<4x80xf32> to vector<4x20xf32>
    %141 = math.tanh %140 : vector<4x20xf32>
    %142 = arith.mulf %138, %127 : vector<4x20xf32>
    %143 = arith.mulf %137, %141 : vector<4x20xf32>
    %144 = arith.addf %142, %143 : vector<4x20xf32>
    %145 = math.tanh %144 : vector<4x20xf32>
    %146 = arith.mulf %139, %145 : vector<4x20xf32>
    %cst_19 = arith.constant dense<0.000000e+00> : vector<4x80xf32>
    %147 = tpu.matmul %146, %2, %cst_19 {dimension_numbers = #tpu.dot_dimension_numbers<[1], [0], [0], [1], [0, 0, 1, 1], [], []>} : vector<4x20xf32>, vector<20x80xf32>, vector<4x80xf32> -> vector<4x80xf32>
    %148 = arith.addf %45, %147 : vector<4x80xf32>
    %149 = arith.negf %148 : vector<4x80xf32>
    %150 = math.exp %149 : vector<4x80xf32>
    %cst_20 = arith.constant 1.000000e+00 : f32
    %151 = vector.broadcast %cst_20 : f32 to vector<4x80xf32>
    %152 = arith.addf %151, %150 : vector<4x80xf32>
    %153 = arith.divf %151, %152 : vector<4x80xf32>
    %154 = vector.extract_strided_slice %153 {offsets = [0, 0], sizes = [4, 20], strides = [1, 1]} : vector<4x80xf32> to vector<4x20xf32>
    %155 = vector.extract_strided_slice %153 {offsets = [0, 20], sizes = [4, 20], strides = [1, 1]} : vector<4x80xf32> to vector<4x20xf32>
    %156 = vector.extract_strided_slice %153 {offsets = [0, 60], sizes = [4, 20], strides = [1, 1]} : vector<4x80xf32> to vector<4x20xf32>
    %157 = vector.extract_strided_slice %148 {offsets = [0, 40], sizes = [4, 20], strides = [1, 1]} : vector<4x80xf32> to vector<4x20xf32>
    %158 = math.tanh %157 : vector<4x20xf32>
    %159 = arith.mulf %155, %144 : vector<4x20xf32>
    %160 = arith.mulf %154, %158 : vector<4x20xf32>
    %161 = arith.addf %159, %160 : vector<4x20xf32>
    %162 = math.tanh %161 : vector<4x20xf32>
    %163 = arith.mulf %156, %162 : vector<4x20xf32>
    %cst_21 = arith.constant dense<0.000000e+00> : vector<4x80xf32>
    %164 = tpu.matmul %163, %2, %cst_21 {dimension_numbers = #tpu.dot_dimension_numbers<[1], [0], [0], [1], [0, 0, 1, 1], [], []>} : vector<4x20xf32>, vector<20x80xf32>, vector<4x80xf32> -> vector<4x80xf32>
    %165 = arith.addf %52, %164 : vector<4x80xf32>
    %166 = arith.negf %165 : vector<4x80xf32>
    %167 = math.exp %166 : vector<4x80xf32>
    %cst_22 = arith.constant 1.000000e+00 : f32
    %168 = vector.broadcast %cst_22 : f32 to vector<4x80xf32>
    %169 = arith.addf %168, %167 : vector<4x80xf32>
    %170 = arith.divf %168, %169 : vector<4x80xf32>
    %171 = vector.extract_strided_slice %170 {offsets = [0, 0], sizes = [4, 20], strides = [1, 1]} : vector<4x80xf32> to vector<4x20xf32>
    %172 = vector.extract_strided_slice %170 {offsets = [0, 20], sizes = [4, 20], strides = [1, 1]} : vector<4x80xf32> to vector<4x20xf32>
    %173 = vector.extract_strided_slice %170 {offsets = [0, 60], sizes = [4, 20], strides = [1, 1]} : vector<4x80xf32> to vector<4x20xf32>
    %174 = vector.extract_strided_slice %165 {offsets = [0, 40], sizes = [4, 20], strides = [1, 1]} : vector<4x80xf32> to vector<4x20xf32>
    %175 = math.tanh %174 : vector<4x20xf32>
    %176 = arith.mulf %172, %161 : vector<4x20xf32>
    %177 = arith.mulf %171, %175 : vector<4x20xf32>
    %178 = arith.addf %176, %177 : vector<4x20xf32>
    %179 = math.tanh %178 : vector<4x20xf32>
    %180 = arith.mulf %173, %179 : vector<4x20xf32>
    %cst_23 = arith.constant dense<0.000000e+00> : vector<4x80xf32>
    %181 = tpu.matmul %180, %2, %cst_23 {dimension_numbers = #tpu.dot_dimension_numbers<[1], [0], [0], [1], [0, 0, 1, 1], [], []>} : vector<4x20xf32>, vector<20x80xf32>, vector<4x80xf32> -> vector<4x80xf32>
    %182 = arith.addf %59, %181 : vector<4x80xf32>
    %183 = arith.negf %182 : vector<4x80xf32>
    %184 = math.exp %183 : vector<4x80xf32>
    %cst_24 = arith.constant 1.000000e+00 : f32
    %185 = vector.broadcast %cst_24 : f32 to vector<4x80xf32>
    %186 = arith.addf %185, %184 : vector<4x80xf32>
    %187 = arith.divf %185, %186 : vector<4x80xf32>
    %188 = vector.extract_strided_slice %187 {offsets = [0, 0], sizes = [4, 20], strides = [1, 1]} : vector<4x80xf32> to vector<4x20xf32>
    %189 = vector.extract_strided_slice %187 {offsets = [0, 20], sizes = [4, 20], strides = [1, 1]} : vector<4x80xf32> to vector<4x20xf32>
    %190 = vector.extract_strided_slice %187 {offsets = [0, 60], sizes = [4, 20], strides = [1, 1]} : vector<4x80xf32> to vector<4x20xf32>
    %191 = vector.extract_strided_slice %182 {offsets = [0, 40], sizes = [4, 20], strides = [1, 1]} : vector<4x80xf32> to vector<4x20xf32>
    %192 = math.tanh %191 : vector<4x20xf32>
    %193 = arith.mulf %189, %178 : vector<4x20xf32>
    %194 = arith.mulf %188, %192 : vector<4x20xf32>
    %195 = arith.addf %193, %194 : vector<4x20xf32>
    %196 = math.tanh %195 : vector<4x20xf32>
    %197 = arith.mulf %190, %196 : vector<4x20xf32>
    %c0_25 = arith.constant 0 : index
    %c0_26 = arith.constant 0 : index
    %198 = vector.load %arg4[%c0_25, %c0_26] : memref<20x1xf32, #tpu.memory_space<vmem>>, vector<20x1xf32>
    %cst_27 = arith.constant dense<0.000000e+00> : vector<4x1xf32>
    %199 = tpu.matmul %197, %198, %cst_27 {dimension_numbers = #tpu.dot_dimension_numbers<[1], [0], [0], [1], [0, 0, 1, 1], [], []>} : vector<4x20xf32>, vector<20x1xf32>, vector<4x1xf32> -> vector<4x1xf32>
    %c0_28 = arith.constant 0 : index
    %c0_29 = arith.constant 0 : index
    %200 = vector.load %arg5[%c0_28, %c0_29] : memref<1x1xf32, #tpu.memory_space<vmem>>, vector<1x1xf32>
    %201 = vector.broadcast %200 : vector<1x1xf32> to vector<4x1xf32>
    %202 = arith.addf %199, %201 : vector<4x1xf32>
    %c0_30 = arith.constant 0 : index
    %c0_31 = arith.constant 0 : index
    %203 = vector.load %arg6[%c0_30, %c0_31] : memref<4x1xf32, #tpu.memory_space<vmem>>, vector<4x1xf32>
    tpu.vector_store %arg6[%c0_30, %c0_31], %202 {strides = array<i32>} : memref<4x1xf32, #tpu.memory_space<vmem>>, vector<4x1xf32>,
    return
  }
}

</mosaic_0001>

<bundles_post_ra>
// kernel: lstm_predictor_forward.1
= control target key start
LH: loop header
LB: loop body
LE: loop exit
PB: predicated region body
PF: predicated region fallthrough
CT: control target
= control target key end

     0   :  { %v2265_v0 = vmov 0.0|0.0   ;;  %vm2266_vm0 = vmmov 0   ;;  %v2267_v3 = vmov 0.0   ;;  %v2268_v5 = vmov 0   ;;  %s2271_s14 = smov 40   ;;  %s2272_s15 = smov 68   ;;  %s2706_s2 = inlined_call_operand.vmem [shape: f32[20,80], index: 2, kind: input, shape index: {}]   ;;  %s2707_s0 = inlined_call_operand.vmem [shape: f32[4,8,1], index: 0, kind: input, shape index: {}]   ;;  %s2708_s1 = inlined_call_operand.vmem [shape: f32[1,80], index: 1, kind: input, shape index: {}]   ;;  %s2709_s3 = inlined_call_operand.vmem [shape: f32[1,80], index: 3, kind: input, shape index: {}]   ;;  %s2710_s4 = inlined_call_operand.vmem [shape: f32[20,1], index: 4, kind: input, shape index: {}]   ;;  %s2711_s5 = inlined_call_operand.<no memory space> [shape: f32[1,1], index: 5, kind: input, shape index: {}]   ;;  %s2712_s6 = inlined_call_operand.vmem [shape: f32[4,1], index: 6, kind: output, shape index: {}]  }
   0x1   :  { %1971 = vmatprep.subr.bf16.mxu0 %v2265_v0  ;;  %v30_v1 = vld [vmem:[%s2706_s2] sm:$0xff]  ;;  %v31_v2 = vld [vmem:[%s2706_s2 + $0x8] sm:$0xff]  ;;  %1896 = vmatprep.mubr.msk.f32.mxu0 %vm2266_vm0, %v2267_v3  ;;  %v27_v8 = vld [vmem:[%s2707_s0 + $0x10] sm:$0xff]  ;;  %vm78_vm1 = vcmask 1043456   ;;  %vm265_vm2 = vcmask 1041409   ;;  %vm268_vm3 = vcmask 1042434  }
   0x2   :  { %v2317_v4 = vpack.c.bf16 %v31_v2, %v30_v1  ;;  %2006 = vset.pattern.permute.xlu0 %v2268_v5  ;;  %v26_v6 = vld [vmem:[%s2707_s0 + $0x8] sm:$0xff]  ;;  %2007 = vset.pattern.permute.xlu1 %v2268_v5  ;;  %v25_v7 = vld [vmem:[%s2707_s0] sm:$0xff]  ;;  %v28_v9 = vld [vmem:[%s2707_s0 + $0x18] sm:$0xff]  ;;  %vm271_vm4 = vcmask 1043459   ;;  %vm74_vm5 = vcmask 162816   ;;  %vm1796_vm6 = vcmask 3072  }
   0x3   :  { %41 = vperm.xlu0 %2006, %v26_v6   ;;  %36 = vperm.xlu1 %2007, %v25_v7   ;;  %v2337_v10 = vld [vmem:[%s2706_s2 + $0x10] sm:$0xf]  ;;  %v1802_v13 = vld [vmem:[%s2708_s1] ss:$0 sm:$0xff]  ;;  %s2269_s1 = smov 88  }
   0x4   :  { %1973 = vmatpush3.bf16.msra.mxu0 %v2317_v4  ;;  %1974 = vmatprep.subr.bf16.mxu1 %v2265_v0  ;;  %v1803_v17 = vld [vmem:[%s2709_s3] ss:$0 sm:$0xff]  ;;  %s2270_s3 = smov 20  }
   0x5   :  { %1894 = vmatprep.subr.mxu0 %v2267_v3  ;;  %1976 = vmatpush3.bf16.msra.mxu1 %v2317_v4 }
   0x6   :  { %1903 = vmatprep.subr.mxu1 %v2267_v3  ;;  %1905 = vmatprep.mubr.msk.f32.mxu1 %vm2266_vm0, %v2267_v3 }
   0x7   :  { %46 = vperm.xlu0 %2006, %v27_v8   ;;  %51 = vperm.xlu1 %2007, %v28_v9  }
   0x8   :  { %1895 = vmatpush3.msk.msra.mxu0 %vm78_vm1, %v2337_v10 }
   0x9   :  { %1897 = vmatmul.mubr.f32.vlgmr.msra.gmra.mrb[0].mxu0 %v2267_v3  ;;  %1904 = vmatpush3.msk.msra.mxu1 %vm78_vm1, %v2337_v10 }
   0xa   :  { %1977 = vmatprep.subr.bf16.mxu0 %v2265_v0  ;;  %1914 = vmatprep.mubr.msk.f32.mxu0 %vm2266_vm0, %v2267_v3 }
   0xb   :  { %1979 = vmatpush3.bf16.msra.mxu0 %v2317_v4  ;;  %1980 = vmatprep.subr.bf16.mxu1 %v2265_v0 }
   0xc   :  { %1912 = vmatprep.subr.mxu0 %v2267_v3 }
   0xf   :  { %1913 = vmatpush3.msk.msra.mxu0 %vm78_vm1, %v2337_v10 }
  0x10   :  { %1983 = vmatprep.subr.bf16.mxu0 %v2265_v0 }
  0x82   :  { %v42_v11 = vpop.permute.xlu0 %41  ;;  %v37_v12 = vpop.permute.xlu1 %36 }
  0x83   :  { %v61_v14 = vmul.f32 %v1802_v13, %v42_v11  ;;  %v60_v16 = vmul.f32 %v1802_v13, %v37_v12 }
  0x85   :  { %v2363_v21 = vadd.f32 %v1803_v17, %v61_v14  ;;  %v2365_v22 = vadd.f32 %v1803_v17, %v60_v16 }
  0x86   :  { %v47_v15 = vpop.permute.xlu0 %46  ;;  %v52_v18 = vpop.permute.xlu1 %51 }
  0x87   :  { %v62_v19 = vmul.f32 %v1802_v13, %v47_v15  ;;  %v63_v25 = vmul.f32 %v1802_v13, %v52_v18 }
  0x89   :  { %v2368_v28 = vadd.f32 %v1803_v17, %v62_v19  ;;  %v2371_v30 = vadd.f32 %v1803_v17, %v63_v25 }
  0xdc   :  { %v148_v20 = vpop.f32.mrb[0].mxu0 }
  0xdd   :  { %v153_v23 = vrot.slane %v148_v20, 1  ;;  %v1898_v24 = vpop.f32.mrb[1].mxu0  ;;  %v154_v26 = vrot.slane %v148_v20, 2  ;;  %v160_v29 = vadd.f32 %v148_v20, %v2365_v22  ;;  %v155_v31 = vrot.slane %v148_v20, 3 }
  0xdf   :  { %v161_v27 = vadd.f32 %v153_v23, %v2363_v21  ;;  %v162_v32 = vadd.f32 %v154_v26, %v2368_v28  ;;  %v163_v33 = vadd.f32 %v155_v31, %v2371_v30  ;;  %v1805_v39 = vmul.f32 -1.442695, %v160_v29 }
  0xe1   :  { %2008 = vtanh.f32 %v161_v27  ;;  %v1806_v38 = vmul.f32 -1.442695, %v161_v27  ;;  %v1807_v40 = vmul.f32 -1.442695, %v162_v32  ;;  %v1808_v41 = vmul.f32 -1.442695, %v163_v33 }
  0xe2   :  { %2010 = vtanh.f32 %v160_v29 }
  0xe3   :  { %2012 = vtanh.f32 %v162_v32 }
  0xe4   :  { %2014 = vtanh.f32 %v163_v33 }
  0xe5   :  { %2016 = vpow2.f32 %v1806_v38 }
  0xe6   :  { %2018 = vpow2.f32 %v1805_v39 }
  0xe7   :  { %2020 = vpow2.f32 %v1807_v40 }
  0xe8   :  { %2022 = vpow2.f32 %v1808_v41 }
  0xeb   :  { %v2009_v34 = vpop.eup %2008 }
  0xec   :  { %202 = vrot.lane.b32.xlu0 %v2009_v34, %s2269_s1  ;;  %v2011_v35 = vpop.eup %2010 }
  0xed   :  { %v2013_v36 = vpop.eup %2012 }
  0xee   :  { %204 = vrot.lane.b32.xlu1 %v2013_v36, %s2269_s1  ;;  %v2015_v37 = vpop.eup %2014 }
  0xef   :  { %v2017_v42 = vpop.eup %2016 }
  0xf0   :  { %200 = vrot.lane.b32.xlu0 %v2011_v35, %s2269_s1  ;;  %v2019_v43 = vpop.eup %2018  ;;  %v177_v44 = vadd.f32 1.0, %v2017_v42 }
  0xf1   :  { %v2021_v45 = vpop.eup %2020  ;;  %v176_v46 = vadd.f32 1.0, %v2019_v43 }
  0xf2   :  { %206 = vrot.lane.b32.xlu1 %v2015_v37, %s2269_s1  ;;  %v178_v47 = vadd.f32 1.0, %v2021_v45  ;;  %2024 = vrcp.f32 %v177_v44  ;;  %v2023_v48 = vpop.eup %2022 }
  0xf3   :  { %2026 = vrcp.f32 %v176_v46  ;;  %v179_v49 = vadd.f32 1.0, %v2023_v48 }
  0xf4   :  { %2028 = vrcp.f32 %v178_v47 }
  0xf5   :  { %2030 = vrcp.f32 %v179_v49 }
  0xfc   :  { %v2025_v50 = vpop.eup %2024 }
  0xfd   :  { %v2027_v53 = vpop.eup %2026  ;;  %v193_v62 = vmul.f32 0.0, %v2025_v50 }
  0xfe   :  { %v2029_v54 = vpop.eup %2028  ;;  %v192_v5 = vmul.f32 0.0, %v2027_v53 }
  0xff   :  { %v2031_v59 = vpop.eup %2030  ;;  %v194_v2 = vmul.f32 0.0, %v2029_v54 }
 0x100   :  { %v195_v11 = vmul.f32 0.0, %v2031_v59 }
 0x15e   :  { %v203_v51 = vpop.permute.xlu0 %202 }
 0x15f   :  { %v213_v52 = vmul.f32 %v2025_v50, %v203_v51 }
 0x160   :  { %v205_v55 = vpop.permute.xlu1 %204 }
 0x161   :  { %222 = vrot.lane.b32.xlu0 %v213_v52, %s2270_s3  ;;  %v214_v57 = vmul.f32 %v2029_v54, %v205_v55 }
 0x162   :  { %v201_v56 = vpop.permute.xlu0 %200 }
 0x163   :  { %v212_v58 = vmul.f32 %v2027_v53, %v201_v56  ;;  %224 = vrot.lane.b32.xlu1 %v214_v57, %s2270_s3 }
 0x164   :  { %v207_v60 = vpop.permute.xlu1 %206 }
 0x165   :  { %220 = vrot.lane.b32.xlu0 %v212_v58, %s2270_s3  ;;  %v215_v61 = vmul.f32 %v2031_v59, %v207_v60 }
 0x167   :  { %226 = vrot.lane.b32.xlu1 %v215_v61, %s2270_s3 }
 0x1d3   :  { %v223_v63 = vpop.permute.xlu0 %222 }
 0x1d4   :  { %v2383_v1 = vadd.f32 %v223_v63, %v193_v62 }
 0x1d5   :  { %v225_v6 = vpop.permute.xlu1 %224 }
 0x1d6   :  { %2032 = vtanh.f32 %v2383_v1  ;;  %v2386_v8 = vadd.f32 %v225_v6, %v194_v2 }
 0x1d7   :  { %v221_v7 = vpop.permute.xlu0 %220 }
 0x1d8   :  { %v2388_v9 = vadd.f32 %v221_v7, %v192_v5  ;;  %2034 = vtanh.f32 %v2386_v8 }
 0x1d9   :  { %v227_v12 = vpop.permute.xlu1 %226 }
 0x1da   :  { %2036 = vtanh.f32 %v2388_v9  ;;  %v2392_v13 = vadd.f32 %v227_v12, %v195_v11 }
 0x1dc   :  { %2038 = vtanh.f32 %v2392_v13 }
 0x1e0   :  { %v2033_v14 = vpop.eup %2032 }
 0x1e1   :  { %246 = vrot.lane.b32.xlu0 %v2033_v14, %s2271_s14 }
 0x1e2   :  { %v2035_v15 = vpop.eup %2034 }
 0x1e3   :  { %248 = vrot.lane.b32.xlu1 %v2035_v15, %s2271_s14 }
 0x1e4   :  { %v2037_v16 = vpop.eup %2036 }
 0x1e5   :  { %244 = vrot.lane.b32.xlu0 %v2037_v16, %s2271_s14 }
 0x1e6   :  { %v2039_v17 = vpop.eup %2038 }
 0x1e7   :  { %250 = vrot.lane.b32.xlu1 %v2039_v17, %s2271_s14 }
 0x253   :  { %v247_v18 = vpop.permute.xlu0 %246 }
 0x254   :  { %v257_v19 = vmul.f32 %v2025_v50, %v247_v18  ;;  %v391_v18 = vrot.slane %v2388_v9, 7 }
 0x255   :  { %v249_v20 = vpop.permute.xlu1 %248 }
 0x256   :  { %v258_v23 = vmul.f32 %v2029_v54, %v249_v20  ;;  %v264_v25 = vrot.slane %v257_v19, 7 }
 0x257   :  { %v245_v24 = vpop.permute.xlu0 %244 }
 0x258   :  { %v256_v26 = vmul.f32 %v2027_v53, %v245_v24  ;;  %v267_v27 = vrot.slane %v258_v23, 6  ;;  %v392_v23 = vrot.slane %v2383_v1, 7  ;;  %v393_v24 = vrot.slane %v2386_v8, 7 }
 0x259   :  { %v251_v31 = vpop.permute.xlu1 %250 }
 0x25a   :  { %v266_v29 = vsel %vm265_vm2, %v264_v25, %v256_v26  ;;  %v259_v32 = vmul.f32 %v2031_v59, %v251_v31 }
 0x25b   :  { %v269_v33 = vsel %vm268_vm3, %v267_v27, %v266_v29 }
 0x25c   :  { %v270_v34 = vrot.slane %v259_v32, 5  ;;  %v394_v32 = vrot.slane %v2392_v13, 7 }
 0x25e   :  { %v272_v35 = vsel %vm271_vm4, %v270_v34, %v269_v33 }
 0x25f   :  { %273 = vrot.lane.b32.xlu0 %v272_v35, %s2272_s15 }
 0x2d1   :  { %v274_v36 = vpop.permute.xlu0 %273 }
 0x2d2   :  { %1906 = vmatmul.mubr.msk.f32.vlgmr.msra.gmra.mrb[0].mxu1 %vm74_vm5, %v274_v36 }
 0x2d3   :  { %1982 = vmatpush3.bf16.msra.mxu1 %v2317_v4  ;;  %1923 = vmatprep.mubr.msk.f32.mxu1 %vm2266_vm0, %v2267_v3 }
 0x2d4   :  { %1921 = vmatprep.subr.mxu1 %v2267_v3 }
 0x2d7   :  { %1922 = vmatpush3.msk.msra.mxu1 %vm78_vm1, %v2337_v10 }
 0x2d8   :  { %1986 = vmatprep.subr.bf16.mxu1 %v2265_v0 }
 0x3a5   :  { %v343_v37 = vpop.f32.mrb[0].mxu1 }
 0x3a6   :  { %v348_v38 = vrot.slane %v343_v37, 7  ;;  %v1907_v39 = vpop.f32.mrb[1].mxu1  ;;  %v349_v40 = vrot.slane %v343_v37, 1  ;;  %v356_v42 = vadd.f32 %v343_v37, %v2363_v21  ;;  %v350_v43 = vrot.slane %v343_v37, 2 }
 0x3a8   :  { %v355_v41 = vadd.f32 %v348_v38, %v2365_v22  ;;  %v357_v44 = vadd.f32 %v349_v40, %v2368_v28  ;;  %v358_v45 = vadd.f32 %v350_v43, %v2371_v30  ;;  %v1812_v51 = vmul.f32 -1.442695, %v356_v42 }
 0x3aa   :  { %2040 = vtanh.f32 %v355_v41  ;;  %v1811_v50 = vmul.f32 -1.442695, %v355_v41  ;;  %v1813_v52 = vmul.f32 -1.442695, %v357_v44  ;;  %v1814_v53 = vmul.f32 -1.442695, %v358_v45 }
 0x3ab   :  { %2042 = vtanh.f32 %v356_v42 }
 0x3ac   :  { %2044 = vtanh.f32 %v357_v44 }
 0x3ad   :  { %2046 = vtanh.f32 %v358_v45 }
 0x3ae   :  { %2048 = vpow2.f32 %v1811_v50 }
 0x3af   :  { %2050 = vpow2.f32 %v1812_v51 }
 0x3b0   :  { %2052 = vpow2.f32 %v1813_v52 }
 0x3b1   :  { %2054 = vpow2.f32 %v1814_v53 }
 0x3b4   :  { %v2041_v46 = vpop.eup %2040 }
 0x3b5   :  { %407 = vrot.lane.b32.xlu1 %v2041_v46, %s2269_s1  ;;  %v2043_v47 = vpop.eup %2042 }
 0x3b6   :  { %v2045_v48 = vpop.eup %2044 }
 0x3b7   :  { %411 = vrot.lane.b32.xlu0 %v2045_v48, %s2269_s1  ;;  %v2047_v49 = vpop.eup %2046 }
 0x3b8   :  { %v2049_v54 = vpop.eup %2048 }
 0x3b9   :  { %409 = vrot.lane.b32.xlu1 %v2043_v47, %s2269_s1  ;;  %v2051_v55 = vpop.eup %2050  ;;  %v371_v56 = vadd.f32 1.0, %v2049_v54 }
 0x3ba   :  { %v2053_v57 = vpop.eup %2052  ;;  %v372_v58 = vadd.f32 1.0, %v2051_v55 }
 0x3bb   :  { %413 = vrot.lane.b32.xlu0 %v2047_v49, %s2269_s1  ;;  %v373_v59 = vadd.f32 1.0, %v2053_v57  ;;  %2056 = vrcp.f32 %v371_v56  ;;  %v2055_v60 = vpop.eup %2054 }
 0x3bc   :  { %2058 = vrcp.f32 %v372_v58  ;;  %v374_v61 = vadd.f32 1.0, %v2055_v60 }
 0x3bd   :  { %2060 = vrcp.f32 %v373_v59 }
 0x3be   :  { %2062 = vrcp.f32 %v374_v61 }
 0x3c5   :  { %v2057_v62 = vpop.eup %2056 }
 0x3c6   :  { %v2059_v5 = vpop.eup %2058  ;;  %v399_v19 = vmul.f32 %v2057_v62, %v391_v18 }
 0x3c7   :  { %v2061_v6 = vpop.eup %2060  ;;  %v400_v27 = vmul.f32 %v2059_v5, %v392_v23 }
 0x3c8   :  { %v2063_v15 = vpop.eup %2062  ;;  %v401_v26 = vmul.f32 %v2061_v6, %v393_v24 }
 0x3c9   :  { %v402_v9 = vmul.f32 %v2063_v15, %v394_v32 }
 0x427   :  { %v408_v63 = vpop.permute.xlu1 %407 }
 0x428   :  { %v419_v2 = vmul.f32 %v2057_v62, %v408_v63 }
 0x429   :  { %v412_v7 = vpop.permute.xlu0 %411 }
 0x42a   :  { %427 = vrot.lane.b32.xlu1 %v419_v2, %s2270_s3  ;;  %v421_v12 = vmul.f32 %v2061_v6, %v412_v7 }
 0x42b   :  { %v410_v11 = vpop.permute.xlu1 %409 }
 0x42c   :  { %v420_v14 = vmul.f32 %v2059_v5, %v410_v11  ;;  %431 = vrot.lane.b32.xlu0 %v421_v12, %s2270_s3 }
 0x42d   :  { %v414_v16 = vpop.permute.xlu0 %413 }
 0x42e   :  { %429 = vrot.lane.b32.xlu1 %v420_v14, %s2270_s3  ;;  %v422_v17 = vmul.f32 %v2063_v15, %v414_v16 }
 0x430   :  { %433 = vrot.lane.b32.xlu0 %v422_v17, %s2270_s3 }
 0x49c   :  { %v428_v20 = vpop.permute.xlu1 %427 }
 0x49d   :  { %v2426_v25 = vadd.f32 %v428_v20, %v399_v19 }
 0x49e   :  { %v432_v29 = vpop.permute.xlu0 %431 }
 0x49f   :  { %2064 = vtanh.f32 %v2426_v25  ;;  %v2430_v33 = vadd.f32 %v432_v29, %v401_v26 }
 0x4a0   :  { %v430_v31 = vpop.permute.xlu1 %429 }
 0x4a1   :  { %v2432_v34 = vadd.f32 %v430_v31, %v400_v27  ;;  %2066 = vtanh.f32 %v2430_v33 }
 0x4a2   :  { %v434_v1 = vpop.permute.xlu0 %433 }
 0x4a3   :  { %2068 = vtanh.f32 %v2432_v34  ;;  %v2436_v8 = vadd.f32 %v434_v1, %v402_v9 }
 0x4a5   :  { %2070 = vtanh.f32 %v2436_v8 }
 0x4a9   :  { %v2065_v35 = vpop.eup %2064 }
 0x4aa   :  { %451 = vrot.lane.b32.xlu1 %v2065_v35, %s2271_s14 }
 0x4ab   :  { %v2067_v36 = vpop.eup %2066 }
 0x4ac   :  { %455 = vrot.lane.b32.xlu0 %v2067_v36, %s2271_s14 }
 0x4ad   :  { %v2069_v37 = vpop.eup %2068 }
 0x4ae   :  { %453 = vrot.lane.b32.xlu1 %v2069_v37, %s2271_s14 }
 0x4af   :  { %v2071_v13 = vpop.eup %2070 }
 0x4b0   :  { %457 = vrot.lane.b32.xlu0 %v2071_v13, %s2271_s14 }
 0x51c   :  { %v452_v38 = vpop.permute.xlu1 %451 }
 0x51d   :  { %v463_v39 = vmul.f32 %v2057_v62, %v452_v38  ;;  %v595_v38 = vrot.slane %v2426_v25, 7 }
 0x51e   :  { %v456_v40 = vpop.permute.xlu0 %455 }
 0x51f   :  { %v465_v41 = vmul.f32 %v2061_v6, %v456_v40  ;;  %v471_v43 = vrot.slane %v463_v39, 1 }
 0x520   :  { %v454_v42 = vpop.permute.xlu1 %453 }
 0x521   :  { %v464_v44 = vmul.f32 %v2059_v5, %v454_v42  ;;  %v473_v45 = vrot.slane %v465_v41, 7  ;;  %v596_v41 = vrot.slane %v2432_v34, 7 }
 0x522   :  { %v458_v46 = vpop.permute.xlu0 %457 }
 0x523   :  { %v472_v47 = vsel %vm265_vm2, %v464_v44, %v471_v43  ;;  %v466_v48 = vmul.f32 %v2063_v15, %v458_v46  ;;  %v598_v43 = vrot.slane %v2436_v8, 7 }
 0x524   :  { %v474_v49 = vsel %vm268_vm3, %v473_v45, %v472_v47  ;;  %v597_v47 = vrot.slane %v2430_v33, 7 }
 0x525   :  { %v475_v50 = vrot.slane %v466_v48, 6 }
 0x527   :  { %v476_v51 = vsel %vm271_vm4, %v475_v50, %v474_v49 }
 0x528   :  { %477 = vrot.lane.b32.xlu1 %v476_v51, %s2272_s15 }
 0x59a   :  { %v478_v52 = vpop.permute.xlu1 %477 }
 0x59b   :  { %1915 = vmatmul.mubr.msk.f32.vlgmr.msra.gmra.mrb[2].mxu0 %vm74_vm5, %v478_v52 }
 0x59c   :  { %1985 = vmatpush3.bf16.msra.mxu0 %v2317_v4  ;;  %1932 = vmatprep.mubr.msk.f32.mxu0 %vm2266_vm0, %v2267_v3 }
 0x59d   :  { %1930 = vmatprep.subr.mxu0 %v2267_v3 }
 0x5a0   :  { %1931 = vmatpush3.msk.msra.mxu0 %vm78_vm1, %v2337_v10 }
 0x5a1   :  { %1989 = vmatprep.subr.bf16.mxu0 %v2265_v0 }
 0x66e   :  { %v547_v53 = vpop.f32.mrb[2].mxu0 }
 0x66f   :  { %v552_v54 = vrot.slane %v547_v53, 6  ;;  %v1916_v55 = vpop.f32.mrb[3].mxu0  ;;  %v553_v56 = vrot.slane %v547_v53, 7  ;;  %v554_v57 = vrot.slane %v547_v53, 1  ;;  %v561_v61 = vadd.f32 %v547_v53, %v2368_v28 }
 0x671   :  { %v559_v58 = vadd.f32 %v552_v54, %v2365_v22  ;;  %v560_v59 = vadd.f32 %v553_v56, %v2363_v21  ;;  %v562_v60 = vadd.f32 %v554_v57, %v2371_v30  ;;  %v1819_v12 = vmul.f32 -1.442695, %v561_v61 }
 0x673   :  { %2072 = vtanh.f32 %v559_v58  ;;  %v1817_v6 = vmul.f32 -1.442695, %v559_v58  ;;  %v1818_v7 = vmul.f32 -1.442695, %v560_v59  ;;  %v1820_v11 = vmul.f32 -1.442695, %v562_v60 }
 0x674   :  { %2074 = vtanh.f32 %v560_v59 }
 0x675   :  { %2076 = vtanh.f32 %v562_v60 }
 0x676   :  { %2078 = vtanh.f32 %v561_v61 }
 0x677   :  { %2080 = vpow2.f32 %v1817_v6 }
 0x678   :  { %2082 = vpow2.f32 %v1818_v7 }
 0x679   :  { %2084 = vpow2.f32 %v1820_v11 }
 0x67a   :  { %2086 = vpow2.f32 %v1819_v12 }
 0x67d   :  { %v2073_v62 = vpop.eup %2072 }
 0x67e   :  { %611 = vrot.lane.b32.xlu0 %v2073_v62, %s2269_s1  ;;  %v2075_v63 = vpop.eup %2074 }
 0x67f   :  { %v2077_v2 = vpop.eup %2076  ;;  %613 = vrot.lane.b32.xlu1 %v2075_v63, %s2269_s1 }
 0x680   :  { %v2079_v5 = vpop.eup %2078 }
 0x681   :  { %v2081_v14 = vpop.eup %2080 }
 0x682   :  { %617 = vrot.lane.b32.xlu0 %v2077_v2, %s2269_s1  ;;  %v575_v15 = vadd.f32 1.0, %v2081_v14  ;;  %v2083_v16 = vpop.eup %2082 }
 0x683   :  { %615 = vrot.lane.b32.xlu1 %v2079_v5, %s2269_s1  ;;  %v2085_v17 = vpop.eup %2084  ;;  %v576_v18 = vadd.f32 1.0, %v2083_v16 }
 0x684   :  { %2088 = vrcp.f32 %v575_v15  ;;  %v2087_v19 = vpop.eup %2086  ;;  %v578_v20 = vadd.f32 1.0, %v2085_v17 }
 0x685   :  { %v577_v23 = vadd.f32 1.0, %v2087_v19  ;;  %2090 = vrcp.f32 %v576_v18 }
 0x686   :  { %2092 = vrcp.f32 %v578_v20 }
 0x687   :  { %2094 = vrcp.f32 %v577_v23 }
 0x68e   :  { %v2089_v24 = vpop.eup %2088 }
 0x68f   :  { %v2091_v29 = vpop.eup %2090  ;;  %v603_v39 = vmul.f32 %v2089_v24, %v595_v38 }
 0x690   :  { %v2093_v32 = vpop.eup %2092  ;;  %v604_v44 = vmul.f32 %v2091_v29, %v596_v41 }
 0x691   :  { %v2095_v36 = vpop.eup %2094  ;;  %v606_v46 = vmul.f32 %v2093_v32, %v598_v43 }
 0x692   :  { %v605_v25 = vmul.f32 %v2095_v36, %v597_v47 }
 0x6f0   :  { %v612_v26 = vpop.permute.xlu0 %611 }
 0x6f1   :  { %v623_v27 = vmul.f32 %v2089_v24, %v612_v26  ;;  %v614_v31 = vpop.permute.xlu1 %613 }
 0x6f2   :  { %v624_v9 = vmul.f32 %v2091_v29, %v614_v31 }
 0x6f3   :  { %631 = vrot.lane.b32.xlu0 %v623_v27, %s2270_s3 }
 0x6f4   :  { %v618_v1 = vpop.permute.xlu0 %617  ;;  %633 = vrot.lane.b32.xlu1 %v624_v9, %s2270_s3 }
 0x6f5   :  { %v626_v35 = vmul.f32 %v2093_v32, %v618_v1  ;;  %v616_v37 = vpop.permute.xlu1 %615 }
 0x6f6   :  { %v625_v13 = vmul.f32 %v2095_v36, %v616_v37 }
 0x6f7   :  { %637 = vrot.lane.b32.xlu0 %v626_v35, %s2270_s3 }
 0x6f8   :  { %635 = vrot.lane.b32.xlu1 %v625_v13, %s2270_s3 }
 0x765   :  { %v632_v40 = vpop.permute.xlu0 %631 }
 0x766   :  { %v2469_v42 = vadd.f32 %v632_v40, %v603_v39  ;;  %v634_v45 = vpop.permute.xlu1 %633 }
 0x767   :  { %v2474_v48 = vadd.f32 %v634_v45, %v604_v44 }
 0x768   :  { %2096 = vtanh.f32 %v2469_v42 }
 0x769   :  { %v638_v49 = vpop.permute.xlu0 %637  ;;  %2098 = vtanh.f32 %v2474_v48 }
 0x76a   :  { %v2476_v50 = vadd.f32 %v638_v49, %v606_v46  ;;  %v636_v34 = vpop.permute.xlu1 %635 }
 0x76b   :  { %v2480_v51 = vadd.f32 %v636_v34, %v605_v25 }
 0x76c   :  { %2100 = vtanh.f32 %v2476_v50 }
 0x76d   :  { %2102 = vtanh.f32 %v2480_v51 }
 0x772   :  { %v2097_v8 = vpop.eup %2096 }
 0x773   :  { %655 = vrot.lane.b32.xlu0 %v2097_v8, %s2271_s14  ;;  %v2099_v52 = vpop.eup %2098 }
 0x774   :  { %657 = vrot.lane.b32.xlu1 %v2099_v52, %s2271_s14 }
 0x776   :  { %v2101_v33 = vpop.eup %2100 }
 0x777   :  { %661 = vrot.lane.b32.xlu0 %v2101_v33, %s2271_s14  ;;  %v2103_v53 = vpop.eup %2102 }
 0x778   :  { %659 = vrot.lane.b32.xlu1 %v2103_v53, %s2271_s14 }
 0x7e5   :  { %v656_v54 = vpop.permute.xlu0 %655 }
 0x7e6   :  { %v667_v55 = vmul.f32 %v2089_v24, %v656_v54  ;;  %v658_v56 = vpop.permute.xlu1 %657  ;;  %v799_v54 = vrot.slane %v2469_v42, 7 }
 0x7e7   :  { %v668_v57 = vmul.f32 %v2091_v29, %v658_v56 }
 0x7e8   :  { %v675_v58 = vrot.slane %v667_v55, 2 }
 0x7e9   :  { %v662_v59 = vpop.permute.xlu0 %661  ;;  %v676_v61 = vrot.slane %v668_v57, 1  ;;  %v800_v57 = vrot.slane %v2474_v48, 7 }
 0x7ea   :  { %v670_v60 = vmul.f32 %v2093_v32, %v662_v59  ;;  %v660_v62 = vpop.permute.xlu1 %659  ;;  %v801_v59 = vrot.slane %v2480_v51, 7 }
 0x7eb   :  { %v677_v2 = vsel %vm265_vm2, %v676_v61, %v675_v58  ;;  %v669_v5 = vmul.f32 %v2095_v36, %v660_v62 }
 0x7ec   :  { %v679_v63 = vrot.slane %v670_v60, 7 }
 0x7ed   :  { %v678_v6 = vsel %vm268_vm3, %v669_v5, %v677_v2 }
 0x7ee   :  { %v680_v7 = vsel %vm271_vm4, %v679_v63, %v678_v6  ;;  %v802_v63 = vrot.slane %v2476_v50, 7 }
 0x7ef   :  { %681 = vrot.lane.b32.xlu0 %v680_v7, %s2272_s15 }
 0x861   :  { %v682_v11 = vpop.permute.xlu0 %681 }
 0x862   :  { %1924 = vmatmul.mubr.msk.f32.vlgmr.msra.gmra.mrb[2].mxu1 %vm74_vm5, %v682_v11 }
 0x863   :  { %1988 = vmatpush3.bf16.msra.mxu1 %v2317_v4  ;;  %1941 = vmatprep.mubr.msk.f32.mxu1 %vm2266_vm0, %v2267_v3 }
 0x864   :  { %1939 = vmatprep.subr.mxu1 %v2267_v3 }
 0x867   :  { %1940 = vmatpush3.msk.msra.mxu1 %vm78_vm1, %v2337_v10 }
 0x868   :  { %1992 = vmatprep.subr.bf16.mxu1 %v2265_v0 }
 0x935   :  { %v751_v12 = vpop.f32.mrb[2].mxu1 }
 0x936   :  { %v756_v14 = vrot.slane %v751_v12, 5  ;;  %v1925_v15 = vpop.f32.mrb[3].mxu1  ;;  %v757_v16 = vrot.slane %v751_v12, 6  ;;  %v758_v17 = vrot.slane %v751_v12, 7  ;;  %v766_v23 = vadd.f32 %v751_v12, %v2371_v30 }
 0x938   :  { %v763_v18 = vadd.f32 %v756_v14, %v2365_v22  ;;  %v764_v19 = vadd.f32 %v757_v16, %v2363_v21  ;;  %v765_v20 = vadd.f32 %v758_v17, %v2368_v28  ;;  %v1826_v1 = vmul.f32 -1.442695, %v766_v23 }
 0x93a   :  { %2104 = vtanh.f32 %v763_v18  ;;  %v1823_v31 = vmul.f32 -1.442695, %v763_v18  ;;  %v1824_v32 = vmul.f32 -1.442695, %v764_v19  ;;  %v1825_v9 = vmul.f32 -1.442695, %v765_v20 }
 0x93b   :  { %2106 = vtanh.f32 %v764_v19 }
 0x93c   :  { %2108 = vtanh.f32 %v765_v20 }
 0x93d   :  { %2110 = vtanh.f32 %v766_v23 }
 0x93e   :  { %2112 = vpow2.f32 %v1823_v31 }
 0x93f   :  { %2114 = vpow2.f32 %v1824_v32 }
 0x940   :  { %2116 = vpow2.f32 %v1825_v9 }
 0x941   :  { %2118 = vpow2.f32 %v1826_v1 }
 0x944   :  { %v2105_v24 = vpop.eup %2104 }
 0x945   :  { %815 = vrot.lane.b32.xlu1 %v2105_v24, %s2269_s1  ;;  %v2107_v26 = vpop.eup %2106 }
 0x946   :  { %v2109_v27 = vpop.eup %2108  ;;  %817 = vrot.lane.b32.xlu0 %v2107_v26, %s2269_s1 }
 0x947   :  { %v2111_v29 = vpop.eup %2110 }
 0x948   :  { %v2113_v35 = vpop.eup %2112 }
 0x949   :  { %819 = vrot.lane.b32.xlu1 %v2109_v27, %s2269_s1  ;;  %v779_v36 = vadd.f32 1.0, %v2113_v35  ;;  %v2115_v37 = vpop.eup %2114 }
 0x94a   :  { %821 = vrot.lane.b32.xlu0 %v2111_v29, %s2269_s1  ;;  %v2117_v13 = vpop.eup %2116  ;;  %v780_v38 = vadd.f32 1.0, %v2115_v37 }
 0x94b   :  { %2120 = vrcp.f32 %v779_v36  ;;  %v2119_v39 = vpop.eup %2118  ;;  %v781_v40 = vadd.f32 1.0, %v2117_v13 }
 0x94c   :  { %v782_v41 = vadd.f32 1.0, %v2119_v39  ;;  %2122 = vrcp.f32 %v780_v38 }
 0x94d   :  { %2124 = vrcp.f32 %v781_v40 }
 0x94e   :  { %2126 = vrcp.f32 %v782_v41 }
 0x955   :  { %v2121_v43 = vpop.eup %2120 }
 0x956   :  { %v2123_v46 = vpop.eup %2122  ;;  %v807_v55 = vmul.f32 %v2121_v43, %v799_v54 }
 0x957   :  { %v2125_v49 = vpop.eup %2124  ;;  %v808_v60 = vmul.f32 %v2123_v46, %v800_v57 }
 0x958   :  { %v2127_v52 = vpop.eup %2126  ;;  %v809_v62 = vmul.f32 %v2125_v49, %v801_v59 }
 0x959   :  { %v810_v42 = vmul.f32 %v2127_v52, %v802_v63 }
 0x9b7   :  { %v816_v44 = vpop.permute.xlu1 %815 }
 0x9b8   :  { %v827_v45 = vmul.f32 %v2121_v43, %v816_v44  ;;  %v818_v47 = vpop.permute.xlu0 %817 }
 0x9b9   :  { %v828_v25 = vmul.f32 %v2123_v46, %v818_v47 }
 0x9ba   :  { %835 = vrot.lane.b32.xlu1 %v827_v45, %s2270_s3 }
 0x9bb   :  { %v820_v34 = vpop.permute.xlu1 %819  ;;  %837 = vrot.lane.b32.xlu0 %v828_v25, %s2270_s3 }
 0x9bc   :  { %v829_v8 = vmul.f32 %v2125_v49, %v820_v34  ;;  %v822_v33 = vpop.permute.xlu0 %821 }
 0x9bd   :  { %v830_v53 = vmul.f32 %v2127_v52, %v822_v33 }
 0x9be   :  { %839 = vrot.lane.b32.xlu1 %v829_v8, %s2270_s3 }
 0x9bf   :  { %841 = vrot.lane.b32.xlu0 %v830_v53, %s2270_s3 }
 0xa2c   :  { %v836_v56 = vpop.permute.xlu1 %835 }
 0xa2d   :  { %v2513_v58 = vadd.f32 %v836_v56, %v807_v55  ;;  %v838_v61 = vpop.permute.xlu0 %837 }
 0xa2e   :  { %v2518_v2 = vadd.f32 %v838_v61, %v808_v60 }
 0xa2f   :  { %2128 = vtanh.f32 %v2513_v58 }
 0xa30   :  { %v840_v5 = vpop.permute.xlu1 %839  ;;  %2130 = vtanh.f32 %v2518_v2 }
 0xa31   :  { %v2520_v6 = vadd.f32 %v840_v5, %v809_v62  ;;  %v842_v48 = vpop.permute.xlu0 %841 }
 0xa32   :  { %v2524_v7 = vadd.f32 %v842_v48, %v810_v42 }
 0xa33   :  { %2132 = vtanh.f32 %v2520_v6 }
 0xa34   :  { %2134 = vtanh.f32 %v2524_v7 }
 0xa39   :  { %v2129_v51 = vpop.eup %2128 }
 0xa3a   :  { %859 = vrot.lane.b32.xlu1 %v2129_v51, %s2271_s14  ;;  %v2131_v11 = vpop.eup %2130 }
 0xa3b   :  { %861 = vrot.lane.b32.xlu0 %v2131_v11, %s2271_s14 }
 0xa3d   :  { %v2133_v50 = vpop.eup %2132 }
 0xa3e   :  { %863 = vrot.lane.b32.xlu1 %v2133_v50, %s2271_s14  ;;  %v2135_v12 = vpop.eup %2134 }
 0xa3f   :  { %865 = vrot.lane.b32.xlu0 %v2135_v12, %s2271_s14  ;;  %v1004_v12 = vrot.slane %v2513_v58, 7 }
 0xaac   :  { %v860_v14 = vpop.permute.xlu1 %859 }
 0xaad   :  { %v871_v15 = vmul.f32 %v2121_v43, %v860_v14  ;;  %v862_v16 = vpop.permute.xlu0 %861  ;;  %v1005_v14 = vrot.slane %v2518_v2, 7 }
 0xaae   :  { %v872_v17 = vmul.f32 %v2123_v46, %v862_v16 }
 0xaaf   :  { %v879_v18 = vrot.slane %v871_v15, 3 }
 0xab0   :  { %v864_v19 = vpop.permute.xlu1 %863  ;;  %v880_v23 = vrot.slane %v872_v17, 2 }
 0xab1   :  { %v873_v20 = vmul.f32 %v2125_v49, %v864_v19  ;;  %v866_v24 = vpop.permute.xlu0 %865 }
 0xab2   :  { %v881_v27 = vsel %vm265_vm2, %v880_v23, %v879_v18  ;;  %v874_v29 = vmul.f32 %v2127_v52, %v866_v24  ;;  %v1006_v23 = vrot.slane %v2520_v6, 7  ;;  %v1007_v24 = vrot.slane %v2524_v7, 7 }
 0xab3   :  { %v882_v26 = vrot.slane %v873_v20, 1 }
 0xab5   :  { %v883_v31 = vsel %vm268_vm3, %v882_v26, %v881_v27 }
 0xab6   :  { %v884_v32 = vsel %vm271_vm4, %v874_v29, %v883_v31 }
 0xab7   :  { %885 = vrot.lane.b32.xlu1 %v884_v32, %s2272_s15 }
 0xb29   :  { %v886_v9 = vpop.permute.xlu1 %885 }
 0xb2a   :  { %1933 = vmatmul.mubr.msk.f32.vlgmr.msra.gmra.mrb[4].mxu0 %vm74_vm5, %v886_v9 }
 0xb2b   :  { %1991 = vmatpush3.bf16.msra.mxu0 %v2317_v4  ;;  %1950 = vmatprep.mubr.msk.f32.mxu0 %vm2266_vm0, %v2267_v3 }
 0xb2c   :  { %1948 = vmatprep.subr.mxu0 %v2267_v3 }
 0xb2f   :  { %1949 = vmatpush3.msk.msra.mxu0 %vm78_vm1, %v2337_v10 }
 0xb30   :  { %1995 = vmatprep.subr.bf16.mxu0 %v2265_v0 }
 0xbfd   :  { %v955_v1 = vpop.f32.mrb[4].mxu0 }
 0xbfe   :  { %v960_v35 = vrot.slane %v955_v1, 4  ;;  %v961_v36 = vrot.slane %v955_v1, 5  ;;  %v1934_v37 = vpop.f32.mrb[5].mxu0  ;;  %v962_v13 = vrot.slane %v955_v1, 6  ;;  %v963_v40 = vrot.slane %v955_v1, 7 }
 0xc00   :  { %v968_v38 = vadd.f32 %v960_v35, %v2365_v22  ;;  %v969_v39 = vadd.f32 %v961_v36, %v2363_v21  ;;  %v970_v41 = vadd.f32 %v962_v13, %v2368_v28  ;;  %v971_v43 = vadd.f32 %v963_v40, %v2371_v30 }
 0xc02   :  { %2136 = vtanh.f32 %v968_v38  ;;  %v1829_v46 = vmul.f32 -1.442695, %v968_v38  ;;  %v1830_v47 = vmul.f32 -1.442695, %v969_v39  ;;  %v1831_v49 = vmul.f32 -1.442695, %v970_v41 }
 0xc03   :  { %2138 = vtanh.f32 %v969_v39  ;;  %v1832_v25 = vmul.f32 -1.442695, %v971_v43 }
 0xc04   :  { %2140 = vtanh.f32 %v970_v41 }
 0xc05   :  { %2142 = vtanh.f32 %v971_v43 }
 0xc06   :  { %2144 = vpow2.f32 %v1829_v46 }
 0xc07   :  { %2146 = vpow2.f32 %v1830_v47 }
 0xc08   :  { %2148 = vpow2.f32 %v1831_v49  ;;  %v2264_v49 = vld [vmem:[%s2706_s2 + $0x10] sm:$0xf] }
 0xc09   :  { %2150 = vpow2.f32 %v1832_v25 }
 0xc0c   :  { %v2137_v10 = vpop.eup %2136 }
 0xc0d   :  { %v2139_v0 = vpop.eup %2138  ;;  %1020 = vrot.lane.b32.xlu0 %v2137_v10, %s2269_s1 }
 0xc0e   :  { %1022 = vrot.lane.b32.xlu1 %v2139_v0, %s2269_s1  ;;  %v2141_v44 = vpop.eup %2140 }
 0xc0f   :  { %v2143_v45 = vpop.eup %2142 }
 0xc10   :  { %v2145_v34 = vpop.eup %2144 }
 0xc11   :  { %1024 = vrot.lane.b32.xlu0 %v2141_v44, %s2269_s1  ;;  %v2147_v8 = vpop.eup %2146  ;;  %v984_v52 = vadd.f32 1.0, %v2145_v34 }
 0xc12   :  { %1026 = vrot.lane.b32.xlu1 %v2143_v45, %s2269_s1  ;;  %v985_v33 = vadd.f32 1.0, %v2147_v8  ;;  %v2149_v53 = vpop.eup %2148 }
 0xc13   :  { %v2151_v54 = vpop.eup %2150  ;;  %2152 = vrcp.f32 %v984_v52  ;;  %v986_v55 = vadd.f32 1.0, %v2149_v53 }
 0xc14   :  { %2154 = vrcp.f32 %v985_v33  ;;  %v987_v56 = vadd.f32 1.0, %v2151_v54 }
 0xc15   :  { %2156 = vrcp.f32 %v986_v55 }
 0xc16   :  { %2158 = vrcp.f32 %v987_v56 }
 0xc1d   :  { %v2153_v57 = vpop.eup %2152 }
 0xc1e   :  { %v2155_v60 = vpop.eup %2154  ;;  %v1012_v15 = vmul.f32 %v2153_v57, %v1004_v12 }
 0xc1f   :  { %v2157_v5 = vpop.eup %2156  ;;  %v1013_v16 = vmul.f32 %v2155_v60, %v1005_v14 }
 0xc20   :  { %v2159_v48 = vpop.eup %2158  ;;  %v1014_v26 = vmul.f32 %v2157_v5, %v1006_v23 }
 0xc21   :  { %v1015_v58 = vmul.f32 %v2159_v48, %v1007_v24 }
 0xc7f   :  { %v1021_v59 = vpop.permute.xlu0 %1020 }
 0xc80   :  { %v1023_v61 = vpop.permute.xlu1 %1022  ;;  %v1032_v62 = vmul.f32 %v2153_v57, %v1021_v59 }
 0xc81   :  { %v1033_v63 = vmul.f32 %v2155_v60, %v1023_v61 }
 0xc82   :  { %1040 = vrot.lane.b32.xlu0 %v1032_v62, %s2270_s3 }
 0xc83   :  { %1042 = vrot.lane.b32.xlu1 %v1033_v63, %s2270_s3  ;;  %v1025_v42 = vpop.permute.xlu0 %1024 }
 0xc84   :  { %v1027_v51 = vpop.permute.xlu1 %1026  ;;  %v1034_v11 = vmul.f32 %v2157_v5, %v1025_v42 }
 0xc85   :  { %v1035_v50 = vmul.f32 %v2159_v48, %v1027_v51 }
 0xc86   :  { %1044 = vrot.lane.b32.xlu0 %v1034_v11, %s2270_s3 }
 0xc87   :  { %1046 = vrot.lane.b32.xlu1 %v1035_v50, %s2270_s3 }
 0xcf4   :  { %v1041_v17 = vpop.permute.xlu0 %1040 }
 0xcf5   :  { %v1043_v18 = vpop.permute.xlu1 %1042  ;;  %v2557_v19 = vadd.f32 %v1041_v17, %v1012_v15 }
 0xcf6   :  { %v2559_v20 = vadd.f32 %v1043_v18, %v1013_v16 }
 0xcf7   :  { %2160 = vtanh.f32 %v2557_v19 }
 0xcf8   :  { %2162 = vtanh.f32 %v2559_v20  ;;  %v1045_v27 = vpop.permute.xlu0 %1044 }
 0xcf9   :  { %v1047_v2 = vpop.permute.xlu1 %1046  ;;  %v2565_v29 = vadd.f32 %v1045_v27, %v1014_v26 }
 0xcfa   :  { %v2567_v31 = vadd.f32 %v1047_v2, %v1015_v58 }
 0xcfb   :  { %2164 = vtanh.f32 %v2565_v29 }
 0xcfc   :  { %2166 = vtanh.f32 %v2567_v31 }
 0xd01   :  { %v2161_v32 = vpop.eup %2160 }
 0xd02   :  { %v2163_v6 = vpop.eup %2162  ;;  %1064 = vrot.lane.b32.xlu0 %v2161_v32, %s2271_s14 }
 0xd03   :  { %1066 = vrot.lane.b32.xlu1 %v2163_v6, %s2271_s14 }
 0xd05   :  { %v2165_v7 = vpop.eup %2164 }
 0xd06   :  { %v2167_v9 = vpop.eup %2166  ;;  %1068 = vrot.lane.b32.xlu0 %v2165_v7, %s2271_s14 }
 0xd07   :  { %1070 = vrot.lane.b32.xlu1 %v2167_v9, %s2271_s14 }
 0xd74   :  { %v1065_v1 = vpop.permute.xlu0 %1064 }
 0xd75   :  { %v1067_v35 = vpop.permute.xlu1 %1066  ;;  %v1076_v37 = vmul.f32 %v2153_v57, %v1065_v1  ;;  %v1210_v1 = vrot.slane %v2557_v19, 7 }
 0xd76   :  { %v1077_v36 = vmul.f32 %v2155_v60, %v1067_v35  ;;  %v1211_v35 = vrot.slane %v2559_v20, 7 }
 0xd77   :  { %v1084_v38 = vrot.slane %v1076_v37, 4 }
 0xd78   :  { %v1085_v13 = vrot.slane %v1077_v36, 3  ;;  %v1069_v39 = vpop.permute.xlu0 %1068 }
 0xd79   :  { %v1071_v40 = vpop.permute.xlu1 %1070  ;;  %v1078_v41 = vmul.f32 %v2157_v5, %v1069_v39 }
 0xd7a   :  { %v1079_v43 = vmul.f32 %v2159_v48, %v1071_v40  ;;  %v1086_v0 = vsel %vm265_vm2, %v1085_v13, %v1084_v38 }
 0xd7b   :  { %v1087_v10 = vrot.slane %v1078_v41, 2  ;;  %v1212_v41 = vrot.slane %v2565_v29, 7 }
 0xd7c   :  { %v1089_v44 = vrot.slane %v1079_v43, 1  ;;  %v1213_v43 = vrot.slane %v2567_v31, 7 }
 0xd7d   :  { %v1088_v45 = vsel %vm268_vm3, %v1087_v10, %v1086_v0 }
 0xd7e   :  { %v1090_v46 = vsel %vm271_vm4, %v1089_v44, %v1088_v45 }
 0xd7f   :  { %1091 = vrot.lane.b32.xlu0 %v1090_v46, %s2272_s15 }
 0xdf1   :  { %v1092_v47 = vpop.permute.xlu0 %1091 }
 0xdf2   :  { %1942 = vmatmul.mubr.msk.f32.vlgmr.msra.gmra.mrb[4].mxu1 %vm74_vm5, %v1092_v47 }
 0xdf3   :  { %1994 = vmatpush3.bf16.msra.mxu1 %v2317_v4  ;;  %1959 = vmatprep.mubr.msk.f32.mxu1 %vm2266_vm0, %v2267_v3 }
 0xdf4   :  { %1957 = vmatprep.subr.mxu1 %v2267_v3 }
 0xdf7   :  { %1958 = vmatpush3.msk.msra.mxu1 %vm78_vm1, %v2264_v49 }
 0xec5   :  { %v1161_v25 = vpop.f32.mrb[4].mxu1 }
 0xec6   :  { %v1166_v34 = vrot.slane %v1161_v25, 3  ;;  %v1167_v8 = vrot.slane %v1161_v25, 4  ;;  %v1943_v52 = vpop.f32.mrb[5].mxu1  ;;  %v1168_v33 = vrot.slane %v1161_v25, 5  ;;  %v1169_v54 = vrot.slane %v1161_v25, 6 }
 0xec8   :  { %v1174_v53 = vadd.f32 %v1166_v34, %v2365_v22  ;;  %v1175_v4 = vadd.f32 %v1167_v8, %v2363_v21  ;;  %v1176_v55 = vadd.f32 %v1168_v33, %v2368_v28  ;;  %v1177_v56 = vadd.f32 %v1169_v54, %v2371_v30 }
 0xeca   :  { %2168 = vtanh.f32 %v1174_v53  ;;  %v1835_v62 = vmul.f32 -1.442695, %v1174_v53  ;;  %v1836_v63 = vmul.f32 -1.442695, %v1175_v4  ;;  %v1837_v5 = vmul.f32 -1.442695, %v1176_v55 }
 0xecb   :  { %2170 = vtanh.f32 %v1175_v4  ;;  %v1838_v42 = vmul.f32 -1.442695, %v1177_v56 }
 0xecc   :  { %2172 = vtanh.f32 %v1176_v55 }
 0xecd   :  { %2174 = vtanh.f32 %v1177_v56 }
 0xece   :  { %2176 = vpow2.f32 %v1835_v62 }
 0xecf   :  { %2178 = vpow2.f32 %v1836_v63 }
 0xed0   :  { %2180 = vpow2.f32 %v1837_v5 }
 0xed1   :  { %2182 = vpow2.f32 %v1838_v42 }
 0xed4   :  { %v2169_v57 = vpop.eup %2168 }
 0xed5   :  { %v2171_v59 = vpop.eup %2170  ;;  %1226 = vrot.lane.b32.xlu1 %v2169_v57, %s2269_s1 }
 0xed6   :  { %1228 = vrot.lane.b32.xlu0 %v2171_v59, %s2269_s1  ;;  %v2173_v60 = vpop.eup %2172 }
 0xed7   :  { %v2175_v61 = vpop.eup %2174 }
 0xed8   :  { %v2177_v48 = vpop.eup %2176 }
 0xed9   :  { %1230 = vrot.lane.b32.xlu1 %v2173_v60, %s2269_s1  ;;  %v2179_v51 = vpop.eup %2178  ;;  %v1190_v11 = vadd.f32 1.0, %v2177_v48 }
 0xeda   :  { %1232 = vrot.lane.b32.xlu0 %v2175_v61, %s2269_s1  ;;  %v1191_v50 = vadd.f32 1.0, %v2179_v51  ;;  %v2181_v12 = vpop.eup %2180 }
 0xedb   :  { %v2183_v14 = vpop.eup %2182  ;;  %2184 = vrcp.f32 %v1190_v11  ;;  %v1192_v15 = vadd.f32 1.0, %v2181_v12 }
 0xedc   :  { %2186 = vrcp.f32 %v1191_v50  ;;  %v1193_v16 = vadd.f32 1.0, %v2183_v14 }
 0xedd   :  { %2188 = vrcp.f32 %v1192_v15 }
 0xede   :  { %2190 = vrcp.f32 %v1193_v16 }
 0xee5   :  { %v2185_v17 = vpop.eup %2184 }
 0xee6   :  { %v2187_v23 = vpop.eup %2186  ;;  %v1218_v36 = vmul.f32 %v2185_v17, %v1210_v1 }
 0xee7   :  { %v2189_v27 = vpop.eup %2188  ;;  %v1219_v37 = vmul.f32 %v2187_v23, %v1211_v35 }
 0xee8   :  { %v2191_v32 = vpop.eup %2190  ;;  %v1220_v10 = vmul.f32 %v2189_v27, %v1212_v41 }
 0xee9   :  { %v1221_v19 = vmul.f32 %v2191_v32, %v1213_v43 }
 0xf47   :  { %v1227_v18 = vpop.permute.xlu1 %1226 }
 0xf48   :  { %v1229_v24 = vpop.permute.xlu0 %1228  ;;  %v1238_v26 = vmul.f32 %v2185_v17, %v1227_v18 }
 0xf49   :  { %v1239_v58 = vmul.f32 %v2187_v23, %v1229_v24 }
 0xf4a   :  { %1246 = vrot.lane.b32.xlu1 %v1238_v26, %s2270_s3 }
 0xf4b   :  { %1248 = vrot.lane.b32.xlu0 %v1239_v58, %s2270_s3  ;;  %v1231_v2 = vpop.permute.xlu1 %1230 }
 0xf4c   :  { %v1233_v6 = vpop.permute.xlu0 %1232  ;;  %v1240_v7 = vmul.f32 %v2189_v27, %v1231_v2 }
 0xf4d   :  { %v1241_v9 = vmul.f32 %v2191_v32, %v1233_v6 }
 0xf4e   :  { %1250 = vrot.lane.b32.xlu1 %v1240_v7, %s2270_s3 }
 0xf4f   :  { %1252 = vrot.lane.b32.xlu0 %v1241_v9, %s2270_s3 }
 0xfbc   :  { %v1247_v13 = vpop.permute.xlu1 %1246 }
 0xfbd   :  { %v1249_v38 = vpop.permute.xlu0 %1248  ;;  %v2602_v39 = vadd.f32 %v1247_v13, %v1218_v36 }
 0xfbe   :  { %v2604_v40 = vadd.f32 %v1249_v38, %v1219_v37 }
 0xfbf   :  { %2192 = vtanh.f32 %v2602_v39 }
 0xfc0   :  { %2194 = vtanh.f32 %v2604_v40  ;;  %v1251_v0 = vpop.permute.xlu1 %1250 }
 0xfc1   :  { %v1253_v20 = vpop.permute.xlu0 %1252  ;;  %v2610_v44 = vadd.f32 %v1251_v0, %v1220_v10 }
 0xfc2   :  { %v2612_v45 = vadd.f32 %v1253_v20, %v1221_v19 }
 0xfc3   :  { %2196 = vtanh.f32 %v2610_v44 }
 0xfc4   :  { %2198 = vtanh.f32 %v2612_v45 }
 0xfc9   :  { %v2193_v46 = vpop.eup %2192 }
 0xfca   :  { %v2195_v29 = vpop.eup %2194  ;;  %1270 = vrot.lane.b32.xlu1 %v2193_v46, %s2271_s14 }
 0xfcb   :  { %1272 = vrot.lane.b32.xlu0 %v2195_v29, %s2271_s14 }
 0xfcd   :  { %v2197_v31 = vpop.eup %2196 }
 0xfce   :  { %v2199_v47 = vpop.eup %2198  ;;  %1274 = vrot.lane.b32.xlu1 %v2197_v31, %s2271_s14 }
 0xfcf   :  { %1276 = vrot.lane.b32.xlu0 %v2199_v47, %s2271_s14  ;;  %v1416_v47 = vrot.slane %v2602_v39, 7 }
0x103c   :  { %v1271_v49 = vpop.permute.xlu1 %1270 }
0x103d   :  { %v1273_v25 = vpop.permute.xlu0 %1272  ;;  %v1282_v8 = vmul.f32 %v2185_v17, %v1271_v49  ;;  %v1417_v49 = vrot.slane %v2604_v40, 7 }
0x103e   :  { %v1283_v34 = vmul.f32 %v2187_v23, %v1273_v25 }
0x103f   :  { %v1290_v33 = vrot.slane %v1282_v8, 5 }
0x1040   :  { %v1291_v52 = vrot.slane %v1283_v34, 4  ;;  %v1275_v53 = vpop.permute.xlu1 %1274 }
0x1041   :  { %v1277_v4 = vpop.permute.xlu0 %1276  ;;  %v1284_v54 = vmul.f32 %v2189_v27, %v1275_v53 }
0x1042   :  { %v1285_v55 = vmul.f32 %v2191_v32, %v1277_v4  ;;  %v1292_v57 = vsel %vm265_vm2, %v1291_v52, %v1290_v33  ;;  %v1418_v4 = vrot.slane %v2610_v44, 7 }
0x1043   :  { %v1293_v56 = vrot.slane %v1284_v54, 3  ;;  %v1419_v54 = vrot.slane %v2612_v45, 7 }
0x1044   :  { %v1295_v59 = vrot.slane %v1285_v55, 2 }
0x1045   :  { %v1294_v60 = vsel %vm268_vm3, %v1293_v56, %v1292_v57 }
0x1046   :  { %v1296_v61 = vsel %vm271_vm4, %v1295_v59, %v1294_v60 }
0x1047   :  { %1297 = vrot.lane.b32.xlu1 %v1296_v61, %s2272_s15 }
0x10b9   :  { %v1298_v62 = vpop.permute.xlu1 %1297 }
0x10ba   :  { %1951 = vmatmul.mubr.msk.f32.vlgmr.msra.gmra.mrb[6].mxu0 %vm74_vm5, %v1298_v62 }
0x10bb   :  { %1968 = vmatprep.mubr.msk.f32.mxu0 %vm2266_vm0, %v2267_v3 }
0x118d   :  { %v1367_v63 = vpop.f32.mrb[6].mxu0 }
0x118e   :  { %v1372_v5 = vrot.slane %v1367_v63, 2  ;;  %v1373_v42 = vrot.slane %v1367_v63, 3  ;;  %v1952_v48 = vpop.f32.mrb[7].mxu0  ;;  %v1374_v51 = vrot.slane %v1367_v63, 4  ;;  %v1375_v12 = vrot.slane %v1367_v63, 5 }
0x1190   :  { %v1380_v11 = vadd.f32 %v1372_v5, %v2365_v22  ;;  %v1381_v50 = vadd.f32 %v1373_v42, %v2363_v21  ;;  %v1382_v14 = vadd.f32 %v1374_v51, %v2368_v28  ;;  %v1383_v15 = vadd.f32 %v1375_v12, %v2371_v30 }
0x1192   :  { %2200 = vtanh.f32 %v1380_v11  ;;  %v1841_v24 = vmul.f32 -1.442695, %v1380_v11  ;;  %v1842_v26 = vmul.f32 -1.442695, %v1381_v50  ;;  %v1843_v58 = vmul.f32 -1.442695, %v1382_v14 }
0x1193   :  { %2202 = vtanh.f32 %v1381_v50  ;;  %v1844_v27 = vmul.f32 -1.442695, %v1383_v15 }
0x1194   :  { %2204 = vtanh.f32 %v1382_v14 }
0x1195   :  { %2206 = vtanh.f32 %v1383_v15 }
0x1196   :  { %2208 = vpow2.f32 %v1841_v24 }
0x1197   :  { %2210 = vpow2.f32 %v1842_v26 }
0x1198   :  { %2212 = vpow2.f32 %v1843_v58 }
0x1199   :  { %2214 = vpow2.f32 %v1844_v27 }
0x119c   :  { %v2201_v16 = vpop.eup %2200 }
0x119d   :  { %v2203_v17 = vpop.eup %2202  ;;  %1432 = vrot.lane.b32.xlu0 %v2201_v16, %s2269_s1 }
0x119e   :  { %1434 = vrot.lane.b32.xlu1 %v2203_v17, %s2269_s1  ;;  %v2205_v18 = vpop.eup %2204 }
0x119f   :  { %v2207_v23 = vpop.eup %2206 }
0x11a0   :  { %v2209_v2 = vpop.eup %2208 }
0x11a1   :  { %1436 = vrot.lane.b32.xlu0 %v2205_v18, %s2269_s1  ;;  %v2211_v32 = vpop.eup %2210  ;;  %v1396_v6 = vadd.f32 1.0, %v2209_v2 }
0x11a2   :  { %1438 = vrot.lane.b32.xlu1 %v2207_v23, %s2269_s1  ;;  %v1397_v7 = vadd.f32 1.0, %v2211_v32  ;;  %v2213_v9 = vpop.eup %2212 }
0x11a3   :  { %v2215_v1 = vpop.eup %2214  ;;  %2216 = vrcp.f32 %v1396_v6  ;;  %v1398_v35 = vadd.f32 1.0, %v2213_v9 }
0x11a4   :  { %2218 = vrcp.f32 %v1397_v7  ;;  %v1399_v36 = vadd.f32 1.0, %v2215_v1 }
0x11a5   :  { %2220 = vrcp.f32 %v1398_v35 }
0x11a6   :  { %2222 = vrcp.f32 %v1399_v36 }
0x11ad   :  { %v2217_v37 = vpop.eup %2216 }
0x11ae   :  { %v2219_v38 = vpop.eup %2218  ;;  %v1424_v25 = vmul.f32 %v2217_v37, %v1416_v47 }
0x11af   :  { %v2221_v19 = vpop.eup %2220  ;;  %v1425_v34 = vmul.f32 %v2219_v38, %v1417_v49 }
0x11b0   :  { %v2223_v20 = vpop.eup %2222  ;;  %v1426_v55 = vmul.f32 %v2221_v19, %v1418_v4 }
0x11b1   :  { %v1427_v39 = vmul.f32 %v2223_v20, %v1419_v54 }
0x120f   :  { %v1433_v13 = vpop.permute.xlu0 %1432 }
0x1210   :  { %v1435_v41 = vpop.permute.xlu1 %1434  ;;  %v1444_v43 = vmul.f32 %v2217_v37, %v1433_v13 }
0x1211   :  { %v1445_v10 = vmul.f32 %v2219_v38, %v1435_v41 }
0x1212   :  { %1452 = vrot.lane.b32.xlu0 %v1444_v43, %s2270_s3 }
0x1213   :  { %1454 = vrot.lane.b32.xlu1 %v1445_v10, %s2270_s3  ;;  %v1437_v0 = vpop.permute.xlu0 %1436 }
0x1214   :  { %v1439_v46 = vpop.permute.xlu1 %1438  ;;  %v1446_v29 = vmul.f32 %v2221_v19, %v1437_v0 }
0x1215   :  { %v1447_v31 = vmul.f32 %v2223_v20, %v1439_v46 }
0x1216   :  { %1456 = vrot.lane.b32.xlu0 %v1446_v29, %s2270_s3 }
0x1217   :  { %1458 = vrot.lane.b32.xlu1 %v1447_v31, %s2270_s3 }
0x1284   :  { %v1453_v8 = vpop.permute.xlu0 %1452 }
0x1285   :  { %v1455_v52 = vpop.permute.xlu1 %1454  ;;  %v2641_v33 = vadd.f32 %v1453_v8, %v1424_v25 }
0x1286   :  { %v2643_v53 = vadd.f32 %v1455_v52, %v1425_v34 }
0x1287   :  { %2224 = vtanh.f32 %v2641_v33 }
0x1288   :  { %2226 = vtanh.f32 %v2643_v53  ;;  %v1457_v56 = vpop.permute.xlu0 %1456 }
0x1289   :  { %v1459_v40 = vpop.permute.xlu1 %1458  ;;  %v2649_v57 = vadd.f32 %v1457_v56, %v1426_v55 }
0x128a   :  { %v2651_v59 = vadd.f32 %v1459_v40, %v1427_v39  ;;  %v1622_v40 = vrot.slane %v2641_v33, 7 }
0x128b   :  { %2228 = vtanh.f32 %v2649_v57 }
0x128c   :  { %2230 = vtanh.f32 %v2651_v59 }
0x1291   :  { %v2225_v60 = vpop.eup %2224 }
0x1292   :  { %v2227_v44 = vpop.eup %2226  ;;  %1476 = vrot.lane.b32.xlu0 %v2225_v60, %s2271_s14  ;;  %v1623_v60 = vrot.slane %v2643_v53, 7 }
0x1293   :  { %1478 = vrot.lane.b32.xlu1 %v2227_v44, %s2271_s14 }
0x1295   :  { %v2229_v45 = vpop.eup %2228 }
0x1296   :  { %v2231_v61 = vpop.eup %2230  ;;  %1480 = vrot.lane.b32.xlu0 %v2229_v45, %s2271_s14 }
0x1297   :  { %1482 = vrot.lane.b32.xlu1 %v2231_v61, %s2271_s14 }
0x1304   :  { %v1477_v62 = vpop.permute.xlu0 %1476 }
0x1305   :  { %v1479_v63 = vpop.permute.xlu1 %1478  ;;  %v1488_v42 = vmul.f32 %v2217_v37, %v1477_v62 }
0x1306   :  { %v1489_v5 = vmul.f32 %v2219_v38, %v1479_v63 }
0x1307   :  { %v1496_v51 = vrot.slane %v1488_v42, 6  ;;  %v1624_v42 = vrot.slane %v2649_v57, 7  ;;  %v1698_v57 = vld [vmem:[%s2710_s4] sm:$0xff] }
0x1308   :  { %v1497_v48 = vrot.slane %v1489_v5, 5  ;;  %v1481_v11 = vpop.permute.xlu0 %1480 }
0x1309   :  { %v1483_v50 = vpop.permute.xlu1 %1482  ;;  %v1490_v12 = vmul.f32 %v2221_v19, %v1481_v11 }
0x130a   :  { %v1491_v14 = vmul.f32 %v2223_v20, %v1483_v50  ;;  %v1498_v16 = vsel %vm265_vm2, %v1497_v48, %v1496_v51  ;;  %v1625_v48 = vrot.slane %v2651_v59, 7  ;;  %v1699_v59 = vld [vmem:[%s2710_s4 + $0x8] sm:$0xff] }
0x130b   :  { %v1499_v15 = vrot.slane %v1490_v12, 4 }
0x130c   :  { %v1501_v17 = vrot.slane %v1491_v14, 3 }
0x130d   :  { %v1500_v18 = vsel %vm268_vm3, %v1499_v15, %v1498_v16  ;;  %v1996_v16 = vpack.c.bf16 %v1699_v59, %v1698_v57 }
0x130e   :  { %v1502_v23 = vsel %vm271_vm4, %v1501_v17, %v1500_v18  ;;  %v1700_v17 = vld [vmem:[%s2710_s4 + $0x10] sm:$0xf] }
0x130f   :  { %1503 = vrot.lane.b32.xlu0 %v1502_v23, %s2272_s15  ;;  %1997 = vmatpush3.bf16.msra.mxu0 %v1996_v16 }
0x1310   :  { %1966 = vmatprep.subr.mxu0 %v2267_v3 }
0x1313   :  { %1967 = vmatpush3.msk.msra.mxu0 %vm78_vm1, %v1700_v17 }
0x1381   :  { %v1504_v24 = vpop.permute.xlu0 %1503 }
0x1382   :  { %1960 = vmatmul.mubr.msk.f32.vlgmr.msra.gmra.mrb[6].mxu1 %vm74_vm5, %v1504_v24 }
0x1455   :  { %v1573_v26 = vpop.f32.mrb[6].mxu1 }
0x1456   :  { %v1578_v58 = vrot.slane %v1573_v26, 1  ;;  %v1579_v27 = vrot.slane %v1573_v26, 2  ;;  %v1961_v2 = vpop.f32.mrb[7].mxu1  ;;  %v1580_v32 = vrot.slane %v1573_v26, 3  ;;  %v1581_v9 = vrot.slane %v1573_v26, 4 }
0x1458   :  { %v1586_v6 = vadd.f32 %v1578_v58, %v2365_v22  ;;  %v1587_v7 = vadd.f32 %v1579_v27, %v2363_v21  ;;  %v1588_v1 = vadd.f32 %v1580_v32, %v2368_v28  ;;  %v1589_v35 = vadd.f32 %v1581_v9, %v2371_v30 }
0x1459   :  { %v11_v58 = vstv %s2711_s5 }
0x145a   :  { %2232 = vtanh.f32 %v1586_v6  ;;  %v1847_v21 = vmul.f32 -1.442695, %v1586_v6  ;;  %v1848_v22 = vmul.f32 -1.442695, %v1587_v7  ;;  %v1849_v28 = vmul.f32 -1.442695, %v1588_v1 }
0x145b   :  { %2234 = vtanh.f32 %v1587_v7  ;;  %v1850_v30 = vmul.f32 -1.442695, %v1589_v35  ;;  %12 = vst [vmem:[#allocation2] sm:$0x1] %v11_v58 }
0x145c   :  { %2236 = vtanh.f32 %v1588_v1 }
0x145d   :  { %2238 = vtanh.f32 %v1589_v35 }
0x145e   :  { %2240 = vpow2.f32 %v1847_v21 }
0x145f   :  { %2242 = vpow2.f32 %v1848_v22 }
0x1460   :  { %2244 = vpow2.f32 %v1849_v28 }
0x1461   :  { %2246 = vpow2.f32 %v1850_v30 }
0x1462   :  { %v1851_v22 = vld [vmem:[#allocation2] ss:$0 sm:$0xff] }
0x1464   :  { %v2233_v36 = vpop.eup %2232 }
0x1465   :  { %v2235_v37 = vpop.eup %2234  ;;  %1638 = vrot.lane.b32.xlu1 %v2233_v36, %s2269_s1 }
0x1466   :  { %1640 = vrot.lane.b32.xlu0 %v2235_v37, %s2269_s1  ;;  %v2237_v13 = vpop.eup %2236 }
0x1467   :  { %v2239_v38 = vpop.eup %2238 }
0x1468   :  { %v2241_v41 = vpop.eup %2240 }
0x1469   :  { %1642 = vrot.lane.b32.xlu1 %v2237_v13, %s2269_s1  ;;  %v2243_v43 = vpop.eup %2242  ;;  %v1602_v10 = vadd.f32 1.0, %v2241_v41 }
0x146a   :  { %1644 = vrot.lane.b32.xlu0 %v2239_v38, %s2269_s1  ;;  %v1603_v19 = vadd.f32 1.0, %v2243_v43  ;;  %v2245_v0 = vpop.eup %2244 }
0x146b   :  { %v2247_v20 = vpop.eup %2246  ;;  %2248 = vrcp.f32 %v1602_v10  ;;  %v1604_v46 = vadd.f32 1.0, %v2245_v0 }
0x146c   :  { %2250 = vrcp.f32 %v1603_v19  ;;  %v1605_v29 = vadd.f32 1.0, %v2247_v20 }
0x146d   :  { %2252 = vrcp.f32 %v1604_v46 }
0x146e   :  { %2254 = vrcp.f32 %v1605_v29 }
0x1475   :  { %v2249_v31 = vpop.eup %2248 }
0x1476   :  { %v2251_v49 = vpop.eup %2250  ;;  %v1630_v44 = vmul.f32 %v2249_v31, %v1622_v40 }
0x1477   :  { %v2253_v52 = vpop.eup %2252  ;;  %v1631_v45 = vmul.f32 %v2251_v49, %v1623_v60 }
0x1478   :  { %v2255_v54 = vpop.eup %2254  ;;  %v1632_v51 = vmul.f32 %v2253_v52, %v1624_v42 }
0x1479   :  { %v1633_v11 = vmul.f32 %v2255_v54, %v1625_v48 }
0x14d7   :  { %v1639_v47 = vpop.permute.xlu1 %1638 }
0x14d8   :  { %v1641_v25 = vpop.permute.xlu0 %1640  ;;  %v1650_v34 = vmul.f32 %v2249_v31, %v1639_v47 }
0x14d9   :  { %v1651_v8 = vmul.f32 %v2251_v49, %v1641_v25 }
0x14da   :  { %1658 = vrot.lane.b32.xlu1 %v1650_v34, %s2270_s3 }
0x14db   :  { %1660 = vrot.lane.b32.xlu0 %v1651_v8, %s2270_s3  ;;  %v1643_v4 = vpop.permute.xlu1 %1642 }
0x14dc   :  { %v1645_v55 = vpop.permute.xlu0 %1644  ;;  %v1652_v39 = vmul.f32 %v2253_v52, %v1643_v4 }
0x14dd   :  { %v1653_v56 = vmul.f32 %v2255_v54, %v1645_v55 }
0x14de   :  { %1662 = vrot.lane.b32.xlu1 %v1652_v39, %s2270_s3 }
0x14df   :  { %1664 = vrot.lane.b32.xlu0 %v1653_v56, %s2270_s3 }
0x154c   :  { %v1659_v61 = vpop.permute.xlu1 %1658 }
0x154d   :  { %v1661_v62 = vpop.permute.xlu0 %1660  ;;  %v1670_v63 = vadd.f32 %v1659_v61, %v1630_v44 }
0x154e   :  { %v1671_v5 = vadd.f32 %v1661_v62, %v1631_v45 }
0x154f   :  { %2256 = vtanh.f32 %v1670_v63 }
0x1550   :  { %2258 = vtanh.f32 %v1671_v5  ;;  %v1663_v50 = vpop.permute.xlu1 %1662 }
0x1551   :  { %v1665_v12 = vpop.permute.xlu0 %1664  ;;  %v1672_v14 = vadd.f32 %v1663_v50, %v1632_v51 }
0x1552   :  { %v1673_v33 = vadd.f32 %v1665_v12, %v1633_v11 }
0x1553   :  { %2260 = vtanh.f32 %v1672_v14 }
0x1554   :  { %2262 = vtanh.f32 %v1673_v33 }
0x1559   :  { %v2257_v53 = vpop.eup %2256 }
0x155a   :  { %v2259_v15 = vpop.eup %2258  ;;  %1682 = vrot.lane.b32.xlu1 %v2257_v53, %s2271_s14 }
0x155b   :  { %1684 = vrot.lane.b32.xlu0 %v2259_v15, %s2271_s14 }
0x155d   :  { %v2261_v18 = vpop.eup %2260 }
0x155e   :  { %v2263_v23 = vpop.eup %2262  ;;  %1686 = vrot.lane.b32.xlu1 %v2261_v18, %s2271_s14 }
0x155f   :  { %1688 = vrot.lane.b32.xlu0 %v2263_v23, %s2271_s14 }
0x15cc   :  { %v1683_v24 = vpop.permute.xlu1 %1682 }
0x15cd   :  { %v1685_v26 = vpop.permute.xlu0 %1684  ;;  %v1694_v3 = vmul.f32 %v2249_v31, %v1683_v24 }
0x15ce   :  { %v1695_v27 = vmul.f32 %v2251_v49, %v1685_v26 }
0x15cf   :  { %v1712_v32 = vrot.slane %v1694_v3, 7 }
0x15d0   :  { %v1713_v2 = vrot.slane %v1695_v27, 6  ;;  %v1687_v6 = vpop.permute.xlu1 %1686 }
0x15d1   :  { %v1689_v7 = vpop.permute.xlu0 %1688  ;;  %v1696_v9 = vmul.f32 %v2253_v52, %v1687_v6 }
0x15d2   :  { %v1697_v1 = vmul.f32 %v2255_v54, %v1689_v7  ;;  %v1714_v36 = vsel %vm265_vm2, %v1713_v2, %v1712_v32 }
0x15d3   :  { %v1715_v35 = vrot.slane %v1696_v9, 5 }
0x15d4   :  { %v1717_v37 = vrot.slane %v1697_v1, 4 }
0x15d5   :  { %v1716_v13 = vsel %vm268_vm3, %v1715_v35, %v1714_v36 }
0x15d6   :  { %v1718_v38 = vsel %vm271_vm4, %v1717_v37, %v1716_v13 }
0x15d7   :  { %1719 = vrot.lane.b32.xlu1 %v1718_v38, %s2272_s15 }
0x1649   :  { %v1720_v21 = vpop.permute.xlu1 %1719 }
0x164a   :  { %1969 = vmatmul.mubr.msk.f32.vlgmr.msra.gmra.mrb[8].mxu0 %vm74_vm5, %v1720_v21 }
0x171d   :  { %v1792_v28 = vpop.f32.mrb[8].mxu0 }
0x171e   :  { %v1793_v30 = vadd.f32 %v1851_v22, %v1792_v28  ;;  %v1970_v41 = vpop.f32.mrb[9].mxu0 }
0x1720   :  { %1797 = vst.msk [vmem:[%s2712_s6] sm:$0xf] %vm1796_vm6, %v1793_v30 }

</bundles_post_ra>
